<compile_context>
chip_gen: v6e
topology: v6e:2x2x1
jax: 0.10.0
libtpu: 0.0.40
codegen_flags: <defaults>
</compile_context>

<pallas_src>
import jax
import jax.numpy as jnp
from jax.experimental import pallas as pl
from jax.experimental.pallas import tpu as pltpu


def vae_kernel(x_ref, eps_ref,
               w1q_ref, s1_ref, b1_ref,
               wh_ref, bh_ref,
               wd1_ref, bd1_ref,
               wd2q_ref, s2_ref, bd2_ref,
               dec_ref, head_ref):
    L = eps_ref.shape[1]
    x = x_ref[...]                                            # (B, D) f32

    # encoder: Linear(D, Hp) + ReLU
    # int8 weight-only quantization: dequantize int-valued weights to bf16
    # (exact), bf16 MXU dot with f32 accumulation, per-column scale after dot.
    w1 = w1q_ref[...].astype(jnp.float32).astype(jnp.bfloat16)       # (D, Hp)
    h = jnp.dot(x.astype(jnp.bfloat16), w1,
                preferred_element_type=jnp.float32)
    h = h * s1_ref[...] + b1_ref[...]
    h = jnp.maximum(h, 0.0)                                   # (B, Hp) f32

    # fused mu / log_var heads, output padded to a 128-lane-dense block
    head = jnp.dot(h.astype(jnp.bfloat16), wh_ref[...],
                   preferred_element_type=jnp.float32) + bh_ref[...]  # (B, 128)
    mu = head[:, :L]
    lv = head[:, L:2 * L]

    # reparametrization trick: z = mu + eps * exp(0.5 * log_var)   (all f32)
    z = mu + eps_ref[...] * jnp.exp(lv * 0.5)                 # (B, L)

    # decoder: Linear(L, Hp) + ReLU, Linear(Hp, D) + Sigmoid
    hd = jnp.dot(z.astype(jnp.bfloat16), wd1_ref[...],
                 preferred_element_type=jnp.float32) + bd1_ref[...]
    hd = jnp.maximum(hd, 0.0)                                 # (B, Hp) f32

    wd2 = wd2q_ref[...].astype(jnp.float32).astype(jnp.bfloat16)     # (Hp, D)
    logits = jnp.dot(hd.astype(jnp.bfloat16), wd2,
                     preferred_element_type=jnp.float32)
    logits = logits * s2_ref[...] + bd2_ref[...]
    # numerically stable sigmoid on the EUP (tanh), no f32 divide on the VPU
    dec_ref[...] = 0.5 * (jnp.tanh(logits * 0.5) + 1.0)       # (B, D)

    head_ref[...] = head                                      # (B, 128)


def init_params(key, in_features, latent_space, hidden=500):
    """Deterministic init mimicking torch.nn.Linear default (U[-1/sqrt(fan_in), +])."""
    def linear(key, fan_in, fan_out):
        kw, kb = jax.random.split(key)
        bound = 1.0 / jnp.sqrt(fan_in)
        w = jax.random.uniform(kw, (fan_in, fan_out), jnp.float32, -bound, bound)
        b = jax.random.uniform(kb, (1, fan_out), jnp.float32, -bound, bound)
        return w, b

    k1, k2, k3, k4, k5 = jax.random.split(key, 5)
    w1,  b1  = linear(k1, in_features,  hidden)
    wmu, bmu = linear(k2, hidden,       latent_space)
    wlv, blv = linear(k3, hidden,       latent_space)
    wd1, bd1 = linear(k4, latent_space, hidden)
    wd2, bd2 = linear(k5, hidden,       in_features)
    return dict(w1=w1, b1=b1, wmu=wmu, bmu=bmu, wlv=wlv, blv=blv,
                wd1=wd1, bd1=bd1, wd2=wd2, bd2=bd2)


def _quantize_per_column_int8(w):
    """Symmetric per-output-column int8 weight quantization (host-side, one-time)."""
    amax = jnp.max(jnp.abs(w), axis=0, keepdims=True)          # (1, out)
    scale = jnp.where(amax > 0, amax / 127.0, 1.0)             # guard all-zero (padded) cols
    q = jnp.clip(jnp.round(w / scale), -127.0, 127.0).astype(jnp.int8)
    return q, scale.astype(jnp.float32)


def prepare_params(params, hidden_pad=512, head_pad=128):
    """One-time host-side prep:
       * pad hidden 500->512 with zeros (exact no-op through ReLU / zero K rows),
       * fuse mu/log_var heads and pad head width 2L->128 lanes (zeros),
       * int8-quantize the big weights (w1, wd2) with per-column scales,
       * cast the small streamed weights (wh, wd1) to bf16."""
    H = params["w1"].shape[1]
    L = params["wmu"].shape[1]
    pad = hidden_pad - H

    w1p  = jnp.pad(params["w1"],  ((0, 0),  (0, pad)))
    b1p  = jnp.pad(params["b1"],  ((0, 0),  (0, pad)))
    wd1p = jnp.pad(params["wd1"], ((0, 0),  (0, pad)))
    bd1p = jnp.pad(params["bd1"], ((0, 0),  (0, pad)))
    wmup = jnp.pad(params["wmu"], ((0, pad), (0, 0)))
    wlvp = jnp.pad(params["wlv"], ((0, pad), (0, 0)))
    wd2p = jnp.pad(params["wd2"], ((0, pad), (0, 0)))

    # fused mu / log_var head, then pad its output width to 128 lanes
    wh = jnp.concatenate([wmup, wlvp], axis=1)                       # (Hp, 2L)
    bh = jnp.concatenate([params["bmu"], params["blv"]], axis=1)     # (1, 2L)
    hpad = head_pad - 2 * L
    wh = jnp.pad(wh, ((0, 0), (0, hpad)))                            # (Hp, 128)
    bh = jnp.pad(bh, ((0, 0), (0, hpad)))                            # (1, 128)

    w1q, s1 = _quantize_per_column_int8(w1p)
    wd2q, s2 = _quantize_per_column_int8(wd2p)

    return dict(
        w1q=w1q, s1=s1, b1=b1p,                       # big: int8 stream + f32 scales
        wh=wh.astype(jnp.bfloat16), bh=bh,            # small: bf16 stream, f32 bias
        wd1=wd1p.astype(jnp.bfloat16), bd1=bd1p,      # small: bf16 stream, f32 bias
        wd2q=wd2q, s2=s2, bd2=params["bd2"],          # big: int8 stream + f32 scales
    )


def vae_forward(x, eps, p):
    """x: (B, C, H, W) f32; eps: (B, latent) f32; p: prepared params."""
    B = x.shape[0]
    x2d = x.reshape(B, -1)                       # == x.view(batch_size, -1)
    D = x2d.shape[1]
    Hp = p["w1q"].shape[1]
    L = eps.shape[1]
    Hh = p["wh"].shape[1]                        # padded head width (128)

    vmem = pl.BlockSpec(memory_space=pltpu.MemorySpace.VMEM)
    args = (x2d, eps,
            p["w1q"], p["s1"], p["b1"],
            p["wh"], p["bh"],
            p["wd1"], p["bd1"],
            p["wd2q"], p["s2"], p["bd2"])

    flops = 2 * B * (D * Hp + Hp * Hh + L * Hp + Hp * D)
    bytes_accessed = (sum(int(a.size) * int(a.dtype.itemsize) for a in args)
                      + B * D * 4 + B * Hh * 4)
    cost = pl.CostEstimate(flops=int(flops),
                           transcendentals=int(B * (L + D)),
                           bytes_accessed=int(bytes_accessed))

    decoded, head = pl.pallas_call(
        vae_kernel,
        out_shape=(
            jax.ShapeDtypeStruct((B, D), jnp.float32),
            jax.ShapeDtypeStruct((B, Hh), jnp.float32),
        ),
        in_specs=[vmem] * len(args),
        out_specs=(vmem, vmem),
        compiler_params=pltpu.CompilerParams(vmem_limit_bytes=8 * 1024 * 1024),
        cost_estimate=cost,
    )(*args)

    mu = head[:, :L]
    log_var = head[:, L:2 * L]
    return decoded, mu, log_var


if __name__ == "__main__":
    # Small shapes consistent with the module: batch=2, C=4, H=W=16 -> in_features=1024.
    B, C, H, W = 2, 4, 16, 16
    in_features = C * H * W
    latent_space = 32

    root = jax.random.PRNGKey(0)
    kx, keps, kp = jax.random.split(root, 3)

    x = jax.random.normal(kx, (B, C, H, W), jnp.float32)
    eps = jax.random.normal(keps, (B, latent_space), jnp.float32)  # torch.randn_like(std)
    params = prepare_params(init_params(kp, in_features, latent_space, hidden=500))

    decoded, mu, log_var = vae_forward(x, eps, params)
    jax.block_until_ready((decoded, mu, log_var))

    assert decoded.shape == (B, in_features)
    assert mu.shape == (B, latent_space)
    assert log_var.shape == (B, latent_space)
    assert bool(jnp.all(jnp.isfinite(decoded)))
    assert bool(jnp.all(jnp.isfinite(mu))) and bool(jnp.all(jnp.isfinite(log_var)))
    assert bool(jnp.all((decoded >= 0.0) & (decoded <= 1.0)))  # sigmoid output range

    print("KERNEL_OK")
</pallas_src>

<mosaic_0001>
module attributes {stable_mosaic.version = 11 : i64} {
  func.func @vae_kernel(%arg0: memref<2x1024xf32, #tpu.memory_space<vmem>>, %arg1: memref<2x32xf32, #tpu.memory_space<vmem>>, %arg2: memref<1024x512xi8, #tpu.memory_space<vmem>>, %arg3: memref<1x512xf32, #tpu.memory_space<vmem>>, %arg4: memref<1x512xf32, #tpu.memory_space<vmem>>, %arg5: memref<512x128xbf16, #tpu.memory_space<vmem>>, %arg6: memref<1x128xf32, #tpu.memory_space<vmem>>, %arg7: memref<32x512xbf16, #tpu.memory_space<vmem>>, %arg8: memref<1x512xf32, #tpu.memory_space<vmem>>, %arg9: memref<512x1024xi8, #tpu.memory_space<vmem>>, %arg10: memref<1x1024xf32, #tpu.memory_space<vmem>>, %arg11: memref<1x1024xf32, #tpu.memory_space<vmem>>, %arg12: memref<2x1024xf32, #tpu.memory_space<vmem>>, %arg13: memref<2x128xf32, #tpu.memory_space<vmem>>) attributes {dimension_semantics = [], scalar_prefetch = 0 : i64, scratch_operands = 0 : i64, tpu.core_type = #tpu.core_type<tc>} {
    %c0 = arith.constant 0 : index
    %c0_0 = arith.constant 0 : index
    %0 = vector.load %arg0[%c0, %c0_0] : memref<2x1024xf32, #tpu.memory_space<vmem>>, vector<2x1024xf32>
    %c0_1 = arith.constant 0 : index
    %c0_2 = arith.constant 0 : index
    %1 = vector.load %arg2[%c0_1, %c0_2] : memref<1024x512xi8, #tpu.memory_space<vmem>>, vector<1024x512xi8>
    %2 = arith.sitofp %1 : vector<1024x512xi8> to vector<1024x512xf32>
    %3 = arith.truncf %2 : vector<1024x512xf32> to vector<1024x512xbf16>
    %4 = arith.truncf %0 : vector<2x1024xf32> to vector<2x1024xbf16>
    %cst = arith.constant dense<0.000000e+00> : vector<2x512xf32>
    %5 = tpu.matmul %4, %3, %cst {dimension_numbers = #tpu.dot_dimension_numbers<[1], [0], [0], [1], [0, 0, 1, 1], [], []>} : vector<2x1024xbf16>, vector<1024x512xbf16>, vector<2x512xf32> -> vector<2x512xf32>
    %c0_3 = arith.constant 0 : index
    %c0_4 = arith.constant 0 : index
    %6 = vector.load %arg3[%c0_3, %c0_4] : memref<1x512xf32, #tpu.memory_space<vmem>>, vector<1x512xf32>
    %7 = vector.broadcast %6 : vector<1x512xf32> to vector<2x512xf32>
    %8 = arith.mulf %5, %7 : vector<2x512xf32>
    %c0_5 = arith.constant 0 : index
    %c0_6 = arith.constant 0 : index
    %9 = vector.load %arg4[%c0_5, %c0_6] : memref<1x512xf32, #tpu.memory_space<vmem>>, vector<1x512xf32>
    %10 = vector.broadcast %9 : vector<1x512xf32> to vector<2x512xf32>
    %11 = arith.addf %8, %10 : vector<2x512xf32>
    %cst_7 = arith.constant 0.000000e+00 : f32
    %12 = vector.broadcast %cst_7 : f32 to vector<2x512xf32>
    %13 = arith.maximumf %11, %12 : vector<2x512xf32>
    %14 = arith.truncf %13 : vector<2x512xf32> to vector<2x512xbf16>
    %c0_8 = arith.constant 0 : index
    %c0_9 = arith.constant 0 : index
    %15 = vector.load %arg5[%c0_8, %c0_9] : memref<512x128xbf16, #tpu.memory_space<vmem>>, vector<512x128xbf16>
    %cst_10 = arith.constant dense<0.000000e+00> : vector<2x128xf32>
    %16 = tpu.matmul %14, %15, %cst_10 {dimension_numbers = #tpu.dot_dimension_numbers<[1], [0], [0], [1], [0, 0, 1, 1], [], []>} : vector<2x512xbf16>, vector<512x128xbf16>, vector<2x128xf32> -> vector<2x128xf32>
    %c0_11 = arith.constant 0 : index
    %c0_12 = arith.constant 0 : index
    %17 = vector.load %arg6[%c0_11, %c0_12] : memref<1x128xf32, #tpu.memory_space<vmem>>, vector<1x128xf32>
    %18 = vector.broadcast %17 : vector<1x128xf32> to vector<2x128xf32>
    %19 = arith.addf %16, %18 : vector<2x128xf32>
    %20 = vector.extract_strided_slice %19 {offsets = [0, 0], sizes = [2, 32], strides = [1, 1]} : vector<2x128xf32> to vector<2x32xf32>
    %21 = vector.extract_strided_slice %19 {offsets = [0, 32], sizes = [2, 32], strides = [1, 1]} : vector<2x128xf32> to vector<2x32xf32>
    %c0_13 = arith.constant 0 : index
    %c0_14 = arith.constant 0 : index
    %22 = vector.load %arg1[%c0_13, %c0_14] : memref<2x32xf32, #tpu.memory_space<vmem>>, vector<2x32xf32>
    %cst_15 = arith.constant 5.000000e-01 : f32
    %23 = vector.broadcast %cst_15 : f32 to vector<2x32xf32>
    %24 = arith.mulf %21, %23 : vector<2x32xf32>
    %25 = math.exp %24 : vector<2x32xf32>
    %26 = arith.mulf %22, %25 : vector<2x32xf32>
    %27 = arith.addf %20, %26 : vector<2x32xf32>
    %28 = arith.truncf %27 : vector<2x32xf32> to vector<2x32xbf16>
    %c0_16 = arith.constant 0 : index
    %c0_17 = arith.constant 0 : index
    %29 = vector.load %arg7[%c0_16, %c0_17] : memref<32x512xbf16, #tpu.memory_space<vmem>>, vector<32x512xbf16>
    %cst_18 = arith.constant dense<0.000000e+00> : vector<2x512xf32>
    %30 = tpu.matmul %28, %29, %cst_18 {dimension_numbers = #tpu.dot_dimension_numbers<[1], [0], [0], [1], [0, 0, 1, 1], [], []>} : vector<2x32xbf16>, vector<32x512xbf16>, vector<2x512xf32> -> vector<2x512xf32>
    %c0_19 = arith.constant 0 : index
    %c0_20 = arith.constant 0 : index
    %31 = vector.load %arg8[%c0_19, %c0_20] : memref<1x512xf32, #tpu.memory_space<vmem>>, vector<1x512xf32>
    %32 = vector.broadcast %31 : vector<1x512xf32> to vector<2x512xf32>
    %33 = arith.addf %30, %32 : vector<2x512xf32>
    %cst_21 = arith.constant 0.000000e+00 : f32
    %34 = vector.broadcast %cst_21 : f32 to vector<2x512xf32>
    %35 = arith.maximumf %33, %34 : vector<2x512xf32>
    %c0_22 = arith.constant 0 : index
    %c0_23 = arith.constant 0 : index
    %36 = vector.load %arg9[%c0_22, %c0_23] : memref<512x1024xi8, #tpu.memory_space<vmem>>, vector<512x1024xi8>
    %37 = arith.sitofp %36 : vector<512x1024xi8> to vector<512x1024xf32>
    %38 = arith.truncf %37 : vector<512x1024xf32> to vector<512x1024xbf16>
    %39 = arith.truncf %35 : vector<2x512xf32> to vector<2x512xbf16>
    %cst_24 = arith.constant dense<0.000000e+00> : vector<2x1024xf32>
    %40 = tpu.matmul %39, %38, %cst_24 {dimension_numbers = #tpu.dot_dimension_numbers<[1], [0], [0], [1], [0, 0, 1, 1], [], []>} : vector<2x512xbf16>, vector<512x1024xbf16>, vector<2x1024xf32> -> vector<2x1024xf32>
    %c0_25 = arith.constant 0 : index
    %c0_26 = arith.constant 0 : index
    %41 = vector.load %arg10[%c0_25, %c0_26] : memref<1x1024xf32, #tpu.memory_space<vmem>>, vector<1x1024xf32>
    %42 = vector.broadcast %41 : vector<1x1024xf32> to vector<2x1024xf32>
    %43 = arith.mulf %40, %42 : vector<2x1024xf32>
    %c0_27 = arith.constant 0 : index
    %c0_28 = arith.constant 0 : index
    %44 = vector.load %arg11[%c0_27, %c0_28] : memref<1x1024xf32, #tpu.memory_space<vmem>>, vector<1x1024xf32>
    %45 = vector.broadcast %44 : vector<1x1024xf32> to vector<2x1024xf32>
    %46 = arith.addf %43, %45 : vector<2x1024xf32>
    %cst_29 = arith.constant 5.000000e-01 : f32
    %47 = vector.broadcast %cst_29 : f32 to vector<2x1024xf32>
    %48 = arith.mulf %46, %47 : vector<2x1024xf32>
    %49 = math.tanh %48 : vector<2x1024xf32>
    %cst_30 = arith.constant 1.000000e+00 : f32
    %50 = vector.broadcast %cst_30 : f32 to vector<2x1024xf32>
    %51 = arith.addf %49, %50 : vector<2x1024xf32>
    %cst_31 = arith.constant 5.000000e-01 : f32
    %52 = vector.broadcast %cst_31 : f32 to vector<2x1024xf32>
    %53 = arith.mulf %52, %51 : vector<2x1024xf32>
    %c0_32 = arith.constant 0 : index
    %c0_33 = arith.constant 0 : index
    %54 = vector.load %arg12[%c0_32, %c0_33] : memref<2x1024xf32, #tpu.memory_space<vmem>>, vector<2x1024xf32>
    tpu.vector_store %arg12[%c0_32, %c0_33], %53 {strides = array<i32>} : memref<2x1024xf32, #tpu.memory_space<vmem>>, vector<2x1024xf32>,
    %c0_34 = arith.constant 0 : index
    %c0_35 = arith.constant 0 : index
    %55 = vector.load %arg13[%c0_34, %c0_35] : memref<2x128xf32, #tpu.memory_space<vmem>>, vector<2x128xf32>
    tpu.vector_store %arg13[%c0_34, %c0_35], %19 {strides = array<i32>} : memref<2x128xf32, #tpu.memory_space<vmem>>, vector<2x128xf32>,
    return
  }
}

</mosaic_0001>

<bundles_post_ra>
// kernel: tpu_custom_call.1
= control target key start
LH: loop header
LB: loop body
LE: loop exit
PB: predicated region body
PF: predicated region fallthrough
CT: control target
= control target key end

     0   :  { %19 = vsyncpa [#allocation3], 0  ;;  %s3166_s0 = inlined_call_operand.hbm [shape: f32[2,1024], index: 0, kind: input, shape index: {}]   ;;  %s3167_s1 = inlined_call_operand.hbm [shape: f32[2,32], index: 1, kind: input, shape index: {}]   ;;  %s3168_s2 = inlined_call_operand.hbm [shape: s8[1024,512], index: 2, kind: input, shape index: {}]   ;;  %s3169_s3 = inlined_call_operand.hbm [shape: f32[1,512], index: 3, kind: input, shape index: {}]   ;;  %s3170_s4 = inlined_call_operand.hbm [shape: f32[1,512], index: 4, kind: input, shape index: {}]   ;;  %s3171_s5 = inlined_call_operand.hbm [shape: bf16[512,128], index: 5, kind: input, shape index: {}]   ;;  %s3172_s6 = inlined_call_operand.hbm [shape: f32[1,128], index: 6, kind: input, shape index: {}]   ;;  %s3173_s7 = inlined_call_operand.hbm [shape: bf16[32,512], index: 7, kind: input, shape index: {}]   ;;  %s3174_s8 = inlined_call_operand.hbm [shape: f32[1,512], index: 8, kind: input, shape index: {}]   ;;  %s3175_s9 = inlined_call_operand.hbm [shape: s8[512,1024], index: 9, kind: input, shape index: {}]   ;;  %s3176_s10 = inlined_call_operand.vmem [shape: f32[1,1024], index: 10, kind: input, shape index: {}]   ;;  %s3177_s11 = inlined_call_operand.vmem [shape: f32[1,1024], index: 11, kind: input, shape index: {}]   ;;  %s3178_s12 = inlined_call_operand.hbm [shape: f32[2,1024], index: 12, kind: output, shape index: {0}]   ;;  %s3179_s13 = inlined_call_operand.hbm [shape: f32[2,128], index: 13, kind: output, shape index: {1}]  }
   0x1   :  { %20 = vsyncpa [#allocation6], 0 }
   0x2   :  { %21 = vsyncpa [#allocation9], 0 }
   0x3   :  { %22 = vsyncpa [#allocation12], 0 }
   0x4   :  { %23 = vsyncpa [#allocation15], 0 }
   0x5   :  { %24 = vsyncpa [#allocation18], 0 }
   0x6   :  { %25 = vsyncpa [#allocation4], 0 }
   0x7   :  { %26 = vsyncpa [#allocation21], 0  ;;  %s2868_s25 = smov [#allocation5]   ;;  %s2869_s27 = smov [#allocation8]  }
   0x8   :  { %s43_s26 = sshll.u32 %s2868_s25, 4  ;;  %s65_s28 = sshll.u32 %s2869_s27, 4  ;;  %s44_s26 = int_to_ptr.vmem [resolvable:$true] %s43_s26  ;;  %s66_s28 = int_to_ptr.vmem [resolvable:$true] %s65_s28 }
   0x9   :  { %s2620_s29 = scalar_lea.vmem %s44_s26, 32  ;;  %p2625_p1 = scmp.lt.s32.totalorder %s44_s26, %s44_s26 }
   0xa   :  { %p2621_p0 = scmp.ne.s32.totalorder %s44_s26, %s2620_s29  ;;  %p2626_p2 = scmp.lt.s32.totalorder %s2620_s29, %s2620_s29 }
   0xc   :  { %p2627_p3 = por %p2626_p2, %p2625_p1 }
   0xe   :  { %p2628_p4 = pnand %p2627_p3, %p2621_p0 }
  0x10   :  { %2631 = shalt.err (!%p2628_p4)
}
  0x11   :  { %46 = dma.hbm_to_vmem [thread:$0]  %s3167_s1, 32, %s44_s26, [#allocation6]  }
  0x12   :  { %s2640_s15 = scalar_lea.vmem %s66_s28, 64  ;;  %p2645_p6 = scmp.lt.s32.totalorder %s66_s28, %s66_s28 }
  0x13   :  { %p2641_p5 = scmp.ne.s32.totalorder %s66_s28, %s2640_s15  ;;  %p2646_p7 = scmp.lt.s32.totalorder %s2640_s15, %s2640_s15 }
  0x15   :  { %p2647_p8 = por %p2646_p7, %p2645_p6 }
  0x17   :  { %p2648_p9 = pnand %p2647_p8, %p2641_p5 }
  0x19   :  { %2651 = shalt.err (!%p2648_p9)
}
  0x1a   :  { %68 = dma.hbm_to_vmem [thread:$0]  %s3169_s3, 64, %s66_s28, [#allocation9]  }
  0x1b   :  { %s2870_s18 = smov [#allocation11]  }
  0x1c   :  { %s84_s19 = sshll.u32 %s2870_s18, 4  ;;  %s85_s19 = int_to_ptr.vmem [resolvable:$true] %s84_s19 }
  0x1d   :  { %s2660_s20 = scalar_lea.vmem %s85_s19, 4096  ;;  %p2665_p11 = scmp.lt.s32.totalorder %s85_s19, %s85_s19 }
  0x1e   :  { %p2661_p10 = scmp.ne.s32.totalorder %s85_s19, %s2660_s20  ;;  %p2666_p12 = scmp.lt.s32.totalorder %s2660_s20, %s2660_s20 }
  0x20   :  { %p2667_p13 = por %p2666_p12, %p2665_p11 }
  0x22   :  { %p2668_p0 = pnand %p2667_p13, %p2661_p10 }
  0x24   :  { %2671 = shalt.err (!%p2668_p0)
}
  0x25   :  { %s2871_s1 = smov 64   ;;  %s2872_s21 = smov 4  }
  0x26   :  { %90 = dma.hbm_to_vmem [thread:$0]  %s3171_s5, 4096, %s85_s19, [#allocation12], %s2871_s1, %s2871_s1, %s2872_s21  }
  0x27   :  { %s2873_s24 = smov [#allocation14]  }
  0x28   :  { %s106_s3 = sshll.u32 %s2873_s24, 4  ;;  %s107_s3 = int_to_ptr.vmem [resolvable:$true] %s106_s3 }
  0x29   :  { %s2680_s25 = scalar_lea.vmem %s107_s3, 1024  ;;  %p2685_p2 = scmp.lt.s32.totalorder %s107_s3, %s107_s3 }
  0x2a   :  { %p2681_p1 = scmp.ne.s32.totalorder %s107_s3, %s2680_s25  ;;  %p2686_p3 = scmp.lt.s32.totalorder %s2680_s25, %s2680_s25 }
  0x2c   :  { %p2687_p4 = por %p2686_p3, %p2685_p2 }
  0x2e   :  { %p2688_p5 = pnand %p2687_p4, %p2681_p1 }
  0x30   :  { %2691 = shalt.err (!%p2688_p5)
}
  0x31   :  { %s2874_s26 = smov 256   ;;  %s2875_s27 = smov 16  }
  0x32   :  { %112 = dma.hbm_to_vmem [thread:$0]  %s3173_s7, 1024, %s107_s3, [#allocation15], %s2874_s26, %s2874_s26, %s2875_s27  }
  0x33   :  { %s2876_s30 = smov [#allocation2]   ;;  %s2877_s15 = smov [#allocation7]  }
  0x34   :  { %s33_s14 = sshll.u32 %s2876_s30, 4  ;;  %s52_s5 = sshll.u32 %s2877_s15, 4  ;;  %s34_s14 = int_to_ptr.vmem [resolvable:$true] %s33_s14  ;;  %s53_s5 = int_to_ptr.vmem [resolvable:$true] %s52_s5 }
  0x35   :  { %s2700_s16 = scalar_lea.vmem %s34_s14, 256  ;;  %p2705_p7 = scmp.lt.s32.totalorder %s34_s14, %s34_s14 }
  0x36   :  { %p2701_p6 = scmp.ne.s32.totalorder %s34_s14, %s2700_s16  ;;  %p2706_p8 = scmp.lt.s32.totalorder %s2700_s16, %s2700_s16 }
  0x38   :  { %p2707_p9 = por %p2706_p8, %p2705_p7 }
  0x3a   :  { %p2708_p10 = pnand %p2707_p9, %p2701_p6 }
  0x3c   :  { %2711 = shalt.err (!%p2708_p10)
}
  0x3d   :  { %36 = dma.hbm_to_vmem [thread:$0]  %s3166_s0, 256, %s34_s14, [#allocation3]  }
  0x3e   :  { %s2720_s19 = scalar_lea.vmem %s53_s5, 16384  ;;  %p2725_p12 = scmp.lt.s32.totalorder %s53_s5, %s53_s5 }
  0x3f   :  { %p2721_p11 = scmp.ne.s32.totalorder %s53_s5, %s2720_s19  ;;  %p2726_p13 = scmp.lt.s32.totalorder %s2720_s19, %s2720_s19 }
  0x41   :  { %p2727_p0 = por %p2726_p13, %p2725_p12 }
  0x43   :  { %p2728_p1 = pnand %p2727_p0, %p2721_p11 }
  0x45   :  { %2731 = shalt.err (!%p2728_p1)
}
  0x46   :  { %s2878_s7 = smov 512   ;;  %s2879_s20 = smov 32  }
  0x47   :  { %58 = dma.hbm_to_vmem [thread:$0]  %s3168_s2, 16384, %s53_s5, [#allocation6], %s2878_s7, %s2878_s7, %s2879_s20  }
  0x48   :  { %s2880_s23 = smov [#allocation10]   ;;  %s2881_s3 = smov [#allocation13]  }
  0x49   :  { %s75_s24 = sshll.u32 %s2880_s23, 4  ;;  %s97_s25 = sshll.u32 %s2881_s3, 4  ;;  %s76_s24 = int_to_ptr.vmem [resolvable:$true] %s75_s24  ;;  %s98_s25 = int_to_ptr.vmem [resolvable:$true] %s97_s25 }
  0x4a   :  { %s2740_s0 = scalar_lea.vmem %s76_s24, 64  ;;  %p2745_p3 = scmp.lt.s32.totalorder %s76_s24, %s76_s24 }
  0x4b   :  { %p2741_p2 = scmp.ne.s32.totalorder %s76_s24, %s2740_s0  ;;  %p2746_p4 = scmp.lt.s32.totalorder %s2740_s0, %s2740_s0 }
  0x4d   :  { %p2747_p5 = por %p2746_p4, %p2745_p3 }
  0x4f   :  { %p2748_p6 = pnand %p2747_p5, %p2741_p2 }
  0x51   :  { %2751 = shalt.err (!%p2748_p6)
}
  0x52   :  { %78 = dma.hbm_to_vmem [thread:$0]  %s3170_s4, 64, %s76_s24, [#allocation9]  }
  0x53   :  { %s2760_s28 = scalar_lea.vmem %s98_s25, 16  ;;  %s2764_s2 = scalar_lea.vmem %s98_s25, 32 }
  0x54   :  { %p2761_p7 = scmp.ne.s32.totalorder %s98_s25, %s2760_s28  ;;  %p2765_p8 = scmp.lt.s32.totalorder %s98_s25, %s98_s25 }
  0x55   :  { %p2766_p9 = scmp.lt.s32.totalorder %s2764_s2, %s2760_s28 }
  0x57   :  { %p2767_p10 = por %p2766_p9, %p2765_p8 }
  0x59   :  { %p2768_p11 = pnand %p2767_p10, %p2761_p7 }
  0x5b   :  { %2771 = shalt.err (!%p2768_p11)
}
  0x5c   :  { %100 = dma.hbm_to_vmem [thread:$0]  %s3172_s6, 16, %s98_s25, [#allocation12]  }
  0x5d   :  { %s2882_s14 = smov [#allocation16]   ;;  %s2883_s5 = smov [#allocation17]  }
  0x5e   :  { %s119_s15 = sshll.u32 %s2882_s14, 4  ;;  %s128_s16 = sshll.u32 %s2883_s5, 4  ;;  %s120_s15 = int_to_ptr.vmem [resolvable:$true] %s119_s15  ;;  %s129_s16 = int_to_ptr.vmem [resolvable:$true] %s128_s16 }
  0x5f   :  { %s2780_s17 = scalar_lea.vmem %s120_s15, 64  ;;  %p2785_p13 = scmp.lt.s32.totalorder %s120_s15, %s120_s15 }
  0x60   :  { %p2781_p12 = scmp.ne.s32.totalorder %s120_s15, %s2780_s17  ;;  %p2786_p0 = scmp.lt.s32.totalorder %s2780_s17, %s2780_s17 }
  0x62   :  { %p2787_p1 = por %p2786_p0, %p2785_p13 }
  0x64   :  { %p2788_p2 = pnand %p2787_p1, %p2781_p12 }
  0x66   :  { %2791 = shalt.err (!%p2788_p2)
}
  0x67   :  { %122 = dma.hbm_to_vmem [thread:$0]  %s3174_s8, 64, %s120_s15, [#allocation15]  }
  0x68   :  { %s2800_s19 = scalar_lea.vmem %s129_s16, 16384  ;;  %p2805_p4 = scmp.lt.s32.totalorder %s129_s16, %s129_s16 }
  0x69   :  { %p2801_p3 = scmp.ne.s32.totalorder %s129_s16, %s2800_s19  ;;  %p2806_p5 = scmp.lt.s32.totalorder %s2800_s19, %s2800_s19 }
  0x6b   :  { %p2807_p6 = por %p2806_p5, %p2805_p4 }
  0x6d   :  { %p2808_p7 = pnand %p2807_p6, %p2801_p3 }
  0x6f   :  { %2811 = shalt.err (!%p2808_p7)
}
  0x70   :  { %s2884_s6 = smov 1024  }
  0x71   :  { %134 = dma.hbm_to_vmem [thread:$0]  %s3175_s9, 16384, %s129_s16, [#allocation18], %s2884_s6, %s2884_s6, %s2871_s1  }
  0x72   :  { %2852 = dma.done.wait [#allocation3], 256  }
  0x73   :  { %2853 = vsyncadd [#allocation3], 4294967040 }
  0x74   :  { %2854 = dma.done.wait [#allocation6], 16416  }
  0x75   :  { %2855 = vsyncadd [#allocation6], 4294950880 }
  0x76   :  { %2856 = dma.done.wait [#allocation9], 128  }
  0x77   :  { %2857 = vsyncadd [#allocation9], 4294967168 }
  0x78   :  { %2858 = dma.done.wait [#allocation12], 4112  }
  0x79   :  { %2859 = vsyncadd [#allocation12], 4294963184 }
  0x7a   :  { %2860 = dma.done.wait [#allocation15], 1088  }
  0x7b   :  { %2861 = vsyncadd [#allocation15], 4294966208 }
  0x7c   :  { %2862 = dma.done.wait [#allocation18], 16384  }
  0x7d   :  { %2863 = vsyncadd [#allocation18], 4294950912  ;;  %v185_v0 = vld [vmem:[#allocation7 + $0x68] sm:$0xff]  ;;  %v184_v2 = vld [vmem:[#allocation7 + $0x60] sm:$0xff]  ;;  %v2885_v18 = vmov 1983009808   ;;  %v562_v20 = vlaneseq }
  0x7e   :  { %v217_v1 = vld [vmem:[#allocation7 + $0x168] sm:$0xff]  ;;  %v325_v3 = vunpack.c.l.s8.bf16 %v185_v0  ;;  %v329_v4 = vunpack.c.h.s8.bf16 %v185_v0  ;;  %v216_v7 = vld [vmem:[#allocation7 + $0x160] sm:$0xff]  ;;  %v328_v8 = vunpack.c.h.s8.bf16 %v184_v2  ;;  %v324_v12 = vunpack.c.l.s8.bf16 %v184_v2  ;;  %s2887_s8 = smov 96  }
  0x7f   :  { %v389_v5 = vunpack.c.l.s8.bf16 %v217_v1  ;;  %v393_v6 = vunpack.c.h.s8.bf16 %v217_v1  ;;  %v392_v9 = vunpack.c.h.s8.bf16 %v216_v7  ;;  %v181_v10 = vld [vmem:[#allocation7 + $0x48] sm:$0xff]  ;;  %v388_v13 = vunpack.c.l.s8.bf16 %v216_v7  ;;  %v180_v16 = vld [vmem:[#allocation7 + $0x40] sm:$0xff] }
  0x80   :  { %v213_v11 = vld [vmem:[#allocation7 + $0x148] sm:$0xff]  ;;  %608 = vmatprep.subr.bf16.mxu0 %v329_v4  ;;  %v321_v14 = vunpack.c.h.s8.bf16 %v181_v10  ;;  %v212_v17 = vld [vmem:[#allocation7 + $0x140] sm:$0xff]  ;;  %v560_v19 = vunpack.c.l.s4 %v2885_v18  ;;  %v320_v21 = vunpack.c.h.s8.bf16 %v180_v16  ;;  %v317_v23 = vunpack.c.l.s8.bf16 %v181_v10 }
  0x81   :  { %649 = vmatprep.subr.bf16.mxu1 %v393_v6  ;;  %609 = vmatpush1.bf16.msra.mxu0 %v328_v8  ;;  %v385_v15 = vunpack.c.h.s8.bf16 %v213_v11  ;;  %v384_v22 = vunpack.c.h.s8.bf16 %v212_v17  ;;  %v381_v24 = vunpack.c.l.s8.bf16 %v213_v11  ;;  %v2993_v26 = vshrl.u32 %v562_v20, 7  ;;  %v177_v27 = vld [vmem:[#allocation7 + $0x28] sm:$0xff]  ;;  %v176_v33 = vld [vmem:[#allocation7 + $0x20] sm:$0xff] }
  0x82   :  { %650 = vmatpush1.bf16.msra.mxu1 %v392_v9  ;;  %610 = vmatprep.subr.bf16.mxu0 %v325_v3  ;;  %v561_v25 = vunpack.c.0.s8 %v560_v19  ;;  %v209_v28 = vld [vmem:[#allocation7 + $0x128] sm:$0xff]  ;;  %v316_v29 = vunpack.c.l.s8.bf16 %v180_v16  ;;  %v380_v30 = vunpack.c.l.s8.bf16 %v212_v17  ;;  %v313_v31 = vunpack.c.h.s8.bf16 %v177_v27  ;;  %v208_v34 = vld [vmem:[#allocation7 + $0x120] sm:$0xff] }
  0x83   :  { %651 = vmatprep.subr.bf16.mxu1 %v389_v5  ;;  %v377_v32 = vunpack.c.h.s8.bf16 %v209_v28  ;;  %v170_v36 = vld [vmem:[#allocation2] sm:$0xff]  ;;  %v312_v37 = vunpack.c.h.s8.bf16 %v176_v33  ;;  %v376_v38 = vunpack.c.h.s8.bf16 %v208_v34  ;;  %v309_v39 = vunpack.c.l.s8.bf16 %v177_v27  ;;  %v172_v51 = vld [vmem:[#allocation7] sm:$0xff] }
  0x84   :  { %v2996_v35 = vsub.s32 %v561_v25, %v2993_v26  ;;  %v373_v40 = vunpack.c.l.s8.bf16 %v209_v28  ;;  %v558_v42 = vcombine.high %v170_v36, %v170_v36  ;;  %v173_v43 = vld [vmem:[#allocation7 + $0x8] sm:$0xff]  ;;  %v308_v47 = vunpack.c.l.s8.bf16 %v176_v33  ;;  %v204_v52 = vld [vmem:[#allocation7 + $0x100] sm:$0xff] }
  0x85   :  { %611 = vmatpush1.bf16.msra.mxu0 %v324_v12  ;;  %v205_v44 = vld [vmem:[#allocation7 + $0x108] sm:$0xff]  ;;  %v372_v48 = vunpack.c.l.s8.bf16 %v208_v34  ;;  %v305_v49 = vunpack.c.h.s8.bf16 %v173_v43  ;;  %v304_v56 = vunpack.c.h.s8.bf16 %v172_v51  ;;  %v368_v57 = vunpack.c.h.s8.bf16 %v204_v52  ;;  %v200_v62 = vld [vmem:[#allocation7 + $0xe0] sm:$0xff] }
  0x86   :  { %652 = vmatpush1.bf16.msra.mxu1 %v388_v13  ;;  %612 = vmatprep.subr.bf16.mxu0 %v321_v14  ;;  %v2999_v41 = vrot.slane %v170_v36, %v2996_v35  ;;  %v3004_v46 = vrot.slane %v558_v42, %v2996_v35  ;;  %v369_v50 = vunpack.c.h.s8.bf16 %v205_v44  ;;  %v301_v58 = vunpack.c.l.s8.bf16 %v173_v43  ;;  %v201_v60 = vld [vmem:[#allocation7 + $0xe8] sm:$0xff]  ;;  %v232_v63 = vld [vmem:[#allocation7 + $0x1e0] sm:$0xff]  ;;  %v171_v36 = vld [vmem:[#allocation2 + $0x8] sm:$0xff] }
  0x87   :  { %653 = vmatprep.subr.bf16.mxu1 %v385_v15  ;;  %v365_v59 = vunpack.c.l.s8.bf16 %v205_v44  ;;  %v233_v61 = vld [vmem:[#allocation7 + $0x1e8] sm:$0xff]  ;;  %v300_v0 = vunpack.c.l.s8.bf16 %v172_v51  ;;  %v364_v1 = vunpack.c.l.s8.bf16 %v204_v52  ;;  %v361_v2 = vunpack.c.h.s8.bf16 %v201_v60  ;;  %v196_v10 = vld [vmem:[#allocation7 + $0xc0] sm:$0xff] }
  0x88   :  { %v573_v45 = vcombine.high %v2999_v41, %v2999_v41  ;;  %v574_v54 = vcombine.high %v3004_v46, %v3004_v46  ;;  %v425_v3 = vunpack.c.h.s8.bf16 %v233_v61  ;;  %v360_v4 = vunpack.c.h.s8.bf16 %v200_v62  ;;  %v197_v8 = vld [vmem:[#allocation7 + $0xc8] sm:$0xff]  ;;  %v228_v11 = vld [vmem:[#allocation7 + $0x1c0] sm:$0xff] }
  0x89   :  { %613 = vmatpush1.bf16.msra.mxu0 %v320_v21  ;;  %v424_v5 = vunpack.c.h.s8.bf16 %v232_v63  ;;  %v357_v6 = vunpack.c.l.s8.bf16 %v201_v60  ;;  %v421_v7 = vunpack.c.l.s8.bf16 %v233_v61  ;;  %v229_v9 = vld [vmem:[#allocation7 + $0x1c8] sm:$0xff]  ;;  %v356_v12 = vunpack.c.l.s8.bf16 %v200_v62  ;;  %v248_v60 = vld [vmem:[#allocation7 + $0x260] sm:$0xff] }
  0x8a   :  { %654 = vmatpush1.bf16.msra.mxu1 %v384_v22  ;;  %614 = vmatprep.subr.bf16.mxu0 %v317_v23  ;;  %v3006_v53 = vpack.c.bf16 %v573_v45, %v573_v45  ;;  %v3011_v55 = vpack.c.bf16 %v574_v54, %v574_v54  ;;  %v420_v13 = vunpack.c.l.s8.bf16 %v232_v63  ;;  %v353_v14 = vunpack.c.h.s8.bf16 %v197_v8  ;;  %v193_v20 = vld [vmem:[#allocation7 + $0xa8] sm:$0xff]  ;;  %v192_v22 = vld [vmem:[#allocation7 + $0xa0] sm:$0xff] }
  0x8b   :  { %655 = vmatprep.subr.bf16.mxu1 %v381_v24  ;;  %v417_v15 = vunpack.c.h.s8.bf16 %v229_v9  ;;  %v352_v16 = vunpack.c.h.s8.bf16 %v196_v10  ;;  %v416_v17 = vunpack.c.h.s8.bf16 %v228_v11  ;;  %v349_v18 = vunpack.c.l.s8.bf16 %v197_v8  ;;  %v225_v21 = vld [vmem:[#allocation7 + $0x1a8] sm:$0xff]  ;;  %v224_v23 = vld [vmem:[#allocation7 + $0x1a0] sm:$0xff] }
  0x8c   :  { %640 = vmatprep.mubr.bf16.mxu0 %v3006_v53  ;;  %681 = vmatprep.mubr.bf16.mxu1 %v3011_v55  ;;  %v413_v19 = vunpack.c.l.s8.bf16 %v229_v9  ;;  %v348_v24 = vunpack.c.l.s8.bf16 %v196_v10  ;;  %v412_v25 = vunpack.c.l.s8.bf16 %v228_v11  ;;  %v345_v27 = vunpack.c.h.s8.bf16 %v193_v20  ;;  %v221_v34 = vld [vmem:[#allocation7 + $0x188] sm:$0xff]  ;;  %v280_v61 = vld [vmem:[#allocation7 + $0x360] sm:$0xff] }
  0x8d   :  { %615 = vmatpush1.bf16.msra.mxu0 %v316_v29  ;;  %v409_v28 = vunpack.c.h.s8.bf16 %v225_v21  ;;  %v344_v29 = vunpack.c.h.s8.bf16 %v192_v22  ;;  %v405_v33 = vunpack.c.l.s8.bf16 %v225_v21  ;;  %v401_v43 = vunpack.c.h.s8.bf16 %v221_v34  ;;  %v281_v51 = vld [vmem:[#allocation7 + $0x368] sm:$0xff] }
  0x8e   :  { %656 = vmatpush1.bf16.msra.mxu1 %v380_v30  ;;  %616 = vmatprep.subr.bf16.mxu0 %v313_v31  ;;  %v408_v30 = vunpack.c.h.s8.bf16 %v224_v23  ;;  %v189_v31 = vld [vmem:[#allocation7 + $0x88] sm:$0xff]  ;;  %v575_v44 = vcombine.high %v171_v36, %v171_v36  ;;  %v3015_v52 = vrot.slane %v171_v36, %v2996_v35  ;;  %vm1420_vm0 = vcmask 261120  }
  0x8f   :  { %657 = vmatprep.subr.bf16.mxu1 %v377_v32  ;;  %v341_v32 = vunpack.c.l.s8.bf16 %v193_v20  ;;  %v337_v42 = vunpack.c.h.s8.bf16 %v189_v31 }
  0x90   :  { %v3018_v54 = vrot.slane %v575_v44, %v2996_v35  ;;  %v590_v62 = vcombine.high %v3015_v52, %v3015_v52 }
  0x91   :  { %617 = vmatpush1.bf16.msra.mxu0 %v312_v37  ;;  %v188_v37 = vld [vmem:[#allocation7 + $0x80] sm:$0xff] }
  0x92   :  { %658 = vmatpush1.bf16.msra.mxu1 %v376_v38  ;;  %618 = vmatprep.subr.bf16.mxu0 %v309_v39  ;;  %v220_v38 = vld [vmem:[#allocation7 + $0x180] sm:$0xff]  ;;  %v340_v39 = vunpack.c.l.s8.bf16 %v192_v22  ;;  %v336_v45 = vunpack.c.h.s8.bf16 %v188_v37  ;;  %v591_v63 = vcombine.high %v3018_v54, %v3018_v54  ;;  %v3032_v8 = vpack.c.bf16 %v590_v62, %v590_v62  ;;  %v261_v62 = vld [vmem:[#allocation7 + $0x2c8] sm:$0xff] }
  0x93   :  { %659 = vmatprep.subr.bf16.mxu1 %v373_v40  ;;  %v404_v40 = vunpack.c.l.s8.bf16 %v224_v23 }
  0x94   :  { %v3034_v9 = vpack.c.bf16 %v591_v63, %v591_v63  ;;  %v293_v63 = vld [vmem:[#allocation7 + $0x3c8] sm:$0xff] }
  0x95   :  { %619 = vmatpush1.bf16.msra.mxu0 %v308_v47  ;;  %v400_v47 = vunpack.c.h.s8.bf16 %v220_v38 }
  0x96   :  { %660 = vmatpush1.bf16.msra.mxu1 %v372_v48  ;;  %620 = vmatprep.subr.bf16.mxu0 %v305_v49  ;;  %v333_v48 = vunpack.c.l.s8.bf16 %v189_v31  ;;  %v397_v49 = vunpack.c.l.s8.bf16 %v221_v34  ;;  %v237_v31 = vld [vmem:[#allocation7 + $0x208] sm:$0xff] }
  0x97   :  { %661 = vmatprep.subr.bf16.mxu1 %v369_v50  ;;  %v249_v50 = vld [vmem:[#allocation7 + $0x268] sm:$0xff]  ;;  %v433_v36 = vunpack.c.h.s8.bf16 %v237_v31 }
  0x99   :  { %621 = vmatpush1.bf16.msra.mxu0 %v304_v56  ;;  %v332_v56 = vunpack.c.l.s8.bf16 %v188_v37 }
  0x9a   :  { %662 = vmatpush1.bf16.msra.mxu1 %v368_v57  ;;  %622 = vmatprep.subr.bf16.mxu0 %v301_v58  ;;  %v396_v57 = vunpack.c.l.s8.bf16 %v220_v38  ;;  %v457_v58 = vunpack.c.h.s8.bf16 %v249_v50  ;;  %v236_v38 = vld [vmem:[#allocation7 + $0x200] sm:$0xff] }
  0x9b   :  { %663 = vmatprep.subr.bf16.mxu1 %v365_v59  ;;  %v521_v59 = vunpack.c.h.s8.bf16 %v281_v51 }
  0x9d   :  { %623 = vmatpush1.bf16.msra.mxu0 %v300_v0  ;;  %v3026_v0 = vpack.c.bf16 %v2999_v41, %v2999_v41  ;;  %v452_v41 = vunpack.c.l.s8.bf16 %v248_v60 }
  0x9e   :  { %664 = vmatpush1.bf16.msra.mxu1 %v364_v1  ;;  %624 = vmatprep.subr.bf16.mxu0 %v361_v2  ;;  %v3030_v1 = vpack.c.bf16 %v3004_v46, %v3004_v46  ;;  %v456_v2 = vunpack.c.h.s8.bf16 %v248_v60  ;;  %v516_v46 = vunpack.c.l.s8.bf16 %v280_v61 }
  0x9f   :  { %665 = vmatprep.subr.bf16.mxu1 %v425_v3  ;;  %v520_v3 = vunpack.c.h.s8.bf16 %v280_v61 }
  0xa1   :  { %625 = vmatpush2.bf16.msra.mxu0 %v360_v4  ;;  %v453_v4 = vunpack.c.l.s8.bf16 %v249_v50 }
  0xa2   :  { %666 = vmatpush2.bf16.msra.mxu1 %v424_v5  ;;  %626 = vmatprep.subr.bf16.mxu0 %v357_v6  ;;  %v517_v5 = vunpack.c.l.s8.bf16 %v281_v51  ;;  %v245_v6 = vld [vmem:[#allocation7 + $0x248] sm:$0xff] }
  0xa3   :  { %667 = vmatprep.subr.bf16.mxu1 %v421_v7  ;;  %v277_v7 = vld [vmem:[#allocation7 + $0x348] sm:$0xff]  ;;  %v449_v10 = vunpack.c.h.s8.bf16 %v245_v6 }
  0xa4   :  { %v513_v11 = vunpack.c.h.s8.bf16 %v277_v7 }
  0xa5   :  { %627 = vmatpush2.bf16.msra.mxu0 %v356_v12  ;;  %v244_v12 = vld [vmem:[#allocation7 + $0x240] sm:$0xff] }
  0xa6   :  { %668 = vmatpush2.bf16.msra.mxu1 %v420_v13  ;;  %628 = vmatprep.subr.bf16.mxu0 %v353_v14  ;;  %v276_v13 = vld [vmem:[#allocation7 + $0x340] sm:$0xff]  ;;  %v448_v14 = vunpack.c.h.s8.bf16 %v244_v12  ;;  %v444_v20 = vunpack.c.l.s8.bf16 %v244_v12  ;;  %v257_v12 = vld [vmem:[#allocation7 + $0x2a8] sm:$0xff] }
  0xa7   :  { %669 = vmatprep.subr.bf16.mxu1 %v417_v15  ;;  %v512_v15 = vunpack.c.h.s8.bf16 %v276_v13  ;;  %v508_v21 = vunpack.c.l.s8.bf16 %v276_v13  ;;  %v289_v13 = vld [vmem:[#allocation7 + $0x3a8] sm:$0xff] }
  0xa9   :  { %629 = vmatpush2.bf16.msra.mxu0 %v352_v16  ;;  %v445_v16 = vunpack.c.l.s8.bf16 %v245_v6  ;;  %v260_v6 = vld [vmem:[#allocation7 + $0x2c0] sm:$0xff] }
  0xaa   :  { %670 = vmatpush2.bf16.msra.mxu1 %v416_v17  ;;  %630 = vmatprep.subr.bf16.mxu0 %v349_v18  ;;  %v509_v17 = vunpack.c.l.s8.bf16 %v277_v7  ;;  %v241_v18 = vld [vmem:[#allocation7 + $0x228] sm:$0xff]  ;;  %v292_v7 = vld [vmem:[#allocation7 + $0x3c0] sm:$0xff] }
  0xab   :  { %671 = vmatprep.subr.bf16.mxu1 %v413_v19  ;;  %v273_v19 = vld [vmem:[#allocation7 + $0x328] sm:$0xff]  ;;  %v441_v22 = vunpack.c.h.s8.bf16 %v241_v18 }
  0xac   :  { %v505_v23 = vunpack.c.h.s8.bf16 %v273_v19 }
  0xad   :  { %631 = vmatpush2.bf16.msra.mxu0 %v348_v24  ;;  %v240_v24 = vld [vmem:[#allocation7 + $0x220] sm:$0xff] }
  0xae   :  { %672 = vmatpush2.bf16.msra.mxu1 %v412_v25  ;;  %632 = vmatprep.subr.bf16.mxu0 %v345_v27  ;;  %v272_v25 = vld [vmem:[#allocation7 + $0x320] sm:$0xff]  ;;  %v440_v27 = vunpack.c.h.s8.bf16 %v240_v24 }
  0xaf   :  { %673 = vmatprep.subr.bf16.mxu1 %v409_v28  ;;  %v504_v28 = vunpack.c.h.s8.bf16 %v272_v25  ;;  %v500_v34 = vunpack.c.l.s8.bf16 %v272_v25  ;;  %v285_v25 = vld [vmem:[#allocation7 + $0x388] sm:$0xff] }
  0xb1   :  { %633 = vmatpush2.bf16.msra.mxu0 %v344_v29  ;;  %v437_v29 = vunpack.c.l.s8.bf16 %v241_v18  ;;  %v256_v18 = vld [vmem:[#allocation7 + $0x2a0] sm:$0xff] }
  0xb2   :  { %674 = vmatpush2.bf16.msra.mxu1 %v408_v30  ;;  %634 = vmatprep.subr.bf16.mxu0 %v341_v32  ;;  %v501_v30 = vunpack.c.l.s8.bf16 %v273_v19  ;;  %v269_v32 = vld [vmem:[#allocation7 + $0x308] sm:$0xff]  ;;  %v288_v19 = vld [vmem:[#allocation7 + $0x3a0] sm:$0xff] }
  0xb3   :  { %675 = vmatprep.subr.bf16.mxu1 %v405_v33  ;;  %v436_v33 = vunpack.c.l.s8.bf16 %v240_v24  ;;  %v497_v37 = vunpack.c.h.s8.bf16 %v269_v32  ;;  %v493_v44 = vunpack.c.l.s8.bf16 %v269_v32  ;;  %v253_v24 = vld [vmem:[#allocation7 + $0x288] sm:$0xff]  ;;  %v284_v32 = vld [vmem:[#allocation7 + $0x380] sm:$0xff] }
  0xb5   :  { %635 = vmatpush2.bf16.msra.mxu0 %v340_v39  ;;  %v268_v39 = vld [vmem:[#allocation7 + $0x300] sm:$0xff] }
  0xb6   :  { %676 = vmatpush2.bf16.msra.mxu1 %v404_v40  ;;  %636 = vmatprep.subr.bf16.mxu0 %v337_v42  ;;  %v432_v40 = vunpack.c.h.s8.bf16 %v236_v38  ;;  %v496_v42 = vunpack.c.h.s8.bf16 %v268_v39 }
  0xb7   :  { %677 = vmatprep.subr.bf16.mxu1 %v401_v43  ;;  %v429_v43 = vunpack.c.l.s8.bf16 %v237_v31  ;;  %v252_v31 = vld [vmem:[#allocation7 + $0x280] sm:$0xff] }
  0xb9   :  { %637 = vmatpush2.bf16.msra.mxu0 %v336_v45  ;;  %v265_v45 = vld [vmem:[#allocation7 + $0x2e8] sm:$0xff] }
  0xba   :  { %678 = vmatpush2.bf16.msra.mxu1 %v400_v47  ;;  %638 = vmatprep.subr.bf16.mxu0 %v333_v48  ;;  %v297_v47 = vld [vmem:[#allocation7 + $0x3e8] sm:$0xff]  ;;  %v428_v48 = vunpack.c.l.s8.bf16 %v236_v38  ;;  %v489_v50 = vunpack.c.h.s8.bf16 %v265_v45  ;;  %v485_v60 = vunpack.c.l.s8.bf16 %v265_v45  ;;  %v187_v38 = vld [vmem:[#allocation7 + $0x78] sm:$0xff]  ;;  %v186_v45 = vld [vmem:[#allocation7 + $0x70] sm:$0xff] }
  0xbb   :  { %679 = vmatprep.subr.bf16.mxu1 %v397_v49  ;;  %v492_v49 = vunpack.c.l.s8.bf16 %v268_v39  ;;  %v553_v51 = vunpack.c.h.s8.bf16 %v297_v47  ;;  %v549_v61 = vunpack.c.l.s8.bf16 %v297_v47  ;;  %v219_v39 = vld [vmem:[#allocation7 + $0x178] sm:$0xff]  ;;  %v218_v47 = vld [vmem:[#allocation7 + $0x170] sm:$0xff] }
  0xbd   :  { %639 = vmatpush2.bf16.msra.mxu0 %v332_v56  ;;  %v264_v56 = vld [vmem:[#allocation7 + $0x2e0] sm:$0xff] }
  0xbe   :  { %680 = vmatpush2.bf16.msra.mxu1 %v396_v57  ;;  %690 = vmatprep.subr.bf16.mxu0 %v457_v58  ;;  %v296_v57 = vld [vmem:[#allocation7 + $0x3e0] sm:$0xff]  ;;  %v488_v58 = vunpack.c.h.s8.bf16 %v264_v56 }
  0xbf   :  { %731 = vmatprep.subr.bf16.mxu1 %v521_v59  ;;  %v552_v59 = vunpack.c.h.s8.bf16 %v296_v57 }
  0xc0   :  { %641 = vmatmul.mubr.bf16.vlgmr.msra.gmra.mxu0 %v3026_v0 }
  0xc1   :  { %682 = vmatmul.mubr.bf16.vlgmr.msra.gmra.mxu1 %v3030_v1  ;;  %691 = vmatpush1.bf16.msra.mxu0 %v456_v2  ;;  %v484_v2 = vunpack.c.l.s8.bf16 %v264_v56  ;;  %v327_v56 = vunpack.c.l.s8.bf16 %v187_v38 }
  0xc2   :  { %732 = vmatpush1.bf16.msra.mxu1 %v520_v3  ;;  %692 = vmatprep.subr.bf16.mxu0 %v453_v4  ;;  %v548_v3 = vunpack.c.l.s8.bf16 %v296_v57  ;;  %v481_v4 = vunpack.c.h.s8.bf16 %v261_v62  ;;  %v391_v57 = vunpack.c.l.s8.bf16 %v219_v39 }
  0xc3   :  { %733 = vmatprep.subr.bf16.mxu1 %v517_v5  ;;  %722 = vmatprep.mubr.bf16.mxu0 %v3032_v8  ;;  %v545_v5 = vunpack.c.h.s8.bf16 %v293_v63 }
  0xc4   :  { %763 = vmatprep.mubr.bf16.mxu1 %v3034_v9 }
  0xc5   :  { %693 = vmatpush1.bf16.msra.mxu0 %v452_v41  ;;  %v480_v41 = vunpack.c.h.s8.bf16 %v260_v6 }
  0xc6   :  { %734 = vmatpush1.bf16.msra.mxu1 %v516_v46  ;;  %694 = vmatprep.subr.bf16.mxu0 %v449_v10  ;;  %v544_v46 = vunpack.c.h.s8.bf16 %v292_v7  ;;  %v477_v10 = vunpack.c.l.s8.bf16 %v261_v62  ;;  %v182_v62 = vld [vmem:[#allocation7 + $0x50] sm:$0xff] }
  0xc7   :  { %735 = vmatprep.subr.bf16.mxu1 %v513_v11  ;;  %v541_v11 = vunpack.c.l.s8.bf16 %v293_v63  ;;  %v214_v63 = vld [vmem:[#allocation7 + $0x150] sm:$0xff] }
  0xc9   :  { %695 = vmatpush1.bf16.msra.mxu0 %v448_v14  ;;  %v476_v14 = vunpack.c.l.s8.bf16 %v260_v6  ;;  %v179_v6 = vld [vmem:[#allocation7 + $0x38] sm:$0xff] }
  0xca   :  { %736 = vmatpush1.bf16.msra.mxu1 %v512_v15  ;;  %696 = vmatprep.subr.bf16.mxu0 %v445_v16  ;;  %v540_v15 = vunpack.c.l.s8.bf16 %v292_v7  ;;  %v473_v16 = vunpack.c.h.s8.bf16 %v257_v12  ;;  %v211_v7 = vld [vmem:[#allocation7 + $0x138] sm:$0xff] }
  0xcb   :  { %737 = vmatprep.subr.bf16.mxu1 %v509_v17  ;;  %v537_v17 = vunpack.c.h.s8.bf16 %v289_v13 }
  0xcd   :  { %697 = vmatpush1.bf16.msra.mxu0 %v444_v20  ;;  %v472_v20 = vunpack.c.h.s8.bf16 %v256_v18 }
  0xce   :  { %738 = vmatpush1.bf16.msra.mxu1 %v508_v21  ;;  %698 = vmatprep.subr.bf16.mxu0 %v441_v22  ;;  %v536_v21 = vunpack.c.h.s8.bf16 %v288_v19  ;;  %v469_v22 = vunpack.c.l.s8.bf16 %v257_v12 }
  0xcf   :  { %739 = vmatprep.subr.bf16.mxu1 %v505_v23  ;;  %v533_v23 = vunpack.c.l.s8.bf16 %v289_v13 }
  0xd1   :  { %699 = vmatpush1.bf16.msra.mxu0 %v440_v27  ;;  %v468_v27 = vunpack.c.l.s8.bf16 %v256_v18 }
  0xd2   :  { %740 = vmatpush1.bf16.msra.mxu1 %v504_v28  ;;  %700 = vmatprep.subr.bf16.mxu0 %v437_v29  ;;  %v532_v28 = vunpack.c.l.s8.bf16 %v288_v19  ;;  %v465_v29 = vunpack.c.h.s8.bf16 %v253_v24 }
  0xd3   :  { %741 = vmatprep.subr.bf16.mxu1 %v501_v30  ;;  %v529_v30 = vunpack.c.h.s8.bf16 %v285_v25 }
  0xd5   :  { %701 = vmatpush1.bf16.msra.mxu0 %v436_v33  ;;  %v464_v33 = vunpack.c.h.s8.bf16 %v252_v31 }
  0xd6   :  { %742 = vmatpush1.bf16.msra.mxu1 %v500_v34  ;;  %702 = vmatprep.subr.bf16.mxu0 %v433_v36  ;;  %v528_v34 = vunpack.c.h.s8.bf16 %v284_v32  ;;  %v461_v36 = vunpack.c.l.s8.bf16 %v253_v24 }
  0xd7   :  { %743 = vmatprep.subr.bf16.mxu1 %v497_v37  ;;  %v525_v37 = vunpack.c.l.s8.bf16 %v285_v25 }
  0xd9   :  { %703 = vmatpush1.bf16.msra.mxu0 %v432_v40  ;;  %v460_v40 = vunpack.c.l.s8.bf16 %v252_v31 }
  0xda   :  { %744 = vmatpush1.bf16.msra.mxu1 %v496_v42  ;;  %704 = vmatprep.subr.bf16.mxu0 %v429_v43  ;;  %v524_v42 = vunpack.c.l.s8.bf16 %v284_v32  ;;  %v331_v43 = vunpack.c.h.s8.bf16 %v187_v38 }
  0xdb   :  { %745 = vmatprep.subr.bf16.mxu1 %v493_v44  ;;  %v395_v44 = vunpack.c.h.s8.bf16 %v219_v39 }
  0xdd   :  { %705 = vmatpush1.bf16.msra.mxu0 %v428_v48  ;;  %v3042_v48 = vpack.c.bf16 %v3015_v52, %v3015_v52  ;;  %v326_v52 = vunpack.c.l.s8.bf16 %v186_v45 }
  0xde   :  { %746 = vmatpush1.bf16.msra.mxu1 %v492_v49  ;;  %706 = vmatprep.subr.bf16.mxu0 %v489_v50  ;;  %v3046_v49 = vpack.c.bf16 %v3018_v54, %v3018_v54  ;;  %v330_v50 = vunpack.c.h.s8.bf16 %v186_v45 }
  0xdf   :  { %747 = vmatprep.subr.bf16.mxu1 %v553_v51  ;;  %v394_v51 = vunpack.c.h.s8.bf16 %v218_v47 }
  0xe1   :  { %707 = vmatpush2.bf16.msra.mxu0 %v488_v58  ;;  %v183_v58 = vld [vmem:[#allocation7 + $0x58] sm:$0xff] }
  0xe2   :  { %748 = vmatpush2.bf16.msra.mxu1 %v552_v59  ;;  %708 = vmatprep.subr.bf16.mxu0 %v485_v60  ;;  %v215_v59 = vld [vmem:[#allocation7 + $0x158] sm:$0xff]  ;;  %v390_v60 = vunpack.c.l.s8.bf16 %v218_v47  ;;  %v323_v54 = vunpack.c.h.s8.bf16 %v183_v58 }
  0xe3   :  { %749 = vmatprep.subr.bf16.mxu1 %v549_v61  ;;  %v387_v61 = vunpack.c.h.s8.bf16 %v215_v59 }
  0xe5   :  { %709 = vmatpush2.bf16.msra.mxu0 %v484_v2  ;;  %v322_v2 = vunpack.c.h.s8.bf16 %v182_v62 }
  0xe6   :  { %750 = vmatpush2.bf16.msra.mxu1 %v548_v3  ;;  %710 = vmatprep.subr.bf16.mxu0 %v481_v4  ;;  %v386_v3 = vunpack.c.h.s8.bf16 %v214_v63  ;;  %v319_v4 = vunpack.c.l.s8.bf16 %v183_v58 }
  0xe7   :  { %751 = vmatprep.subr.bf16.mxu1 %v545_v5  ;;  %v383_v5 = vunpack.c.l.s8.bf16 %v215_v59 }
  0xe9   :  { %711 = vmatpush2.bf16.msra.mxu0 %v480_v41  ;;  %v318_v41 = vunpack.c.l.s8.bf16 %v182_v62 }
  0xea   :  { %752 = vmatpush2.bf16.msra.mxu1 %v544_v46  ;;  %712 = vmatprep.subr.bf16.mxu0 %v477_v10  ;;  %v382_v46 = vunpack.c.l.s8.bf16 %v214_v63  ;;  %v315_v10 = vunpack.c.h.s8.bf16 %v179_v6 }
  0xeb   :  { %753 = vmatprep.subr.bf16.mxu1 %v541_v11  ;;  %v178_v11 = vld [vmem:[#allocation7 + $0x30] sm:$0xff] }
  0xec   :  { %v314_v12 = vunpack.c.h.s8.bf16 %v178_v11  ;;  %v310_v18 = vunpack.c.l.s8.bf16 %v178_v11 }
  0xed   :  { %713 = vmatpush2.bf16.msra.mxu0 %v476_v14  ;;  %v311_v14 = vunpack.c.l.s8.bf16 %v179_v6 }
  0xee   :  { %754 = vmatpush2.bf16.msra.mxu1 %v540_v15  ;;  %714 = vmatprep.subr.bf16.mxu0 %v473_v16  ;;  %v375_v15 = vunpack.c.l.s8.bf16 %v211_v7  ;;  %v175_v16 = vld [vmem:[#allocation7 + $0x18] sm:$0xff] }
  0xef   :  { %755 = vmatprep.subr.bf16.mxu1 %v537_v17  ;;  %v207_v17 = vld [vmem:[#allocation7 + $0x118] sm:$0xff] }
  0xf1   :  { %715 = vmatpush2.bf16.msra.mxu0 %v472_v20  ;;  %v307_v20 = vunpack.c.h.s8.bf16 %v175_v16 }
  0xf2   :  { %756 = vmatpush2.bf16.msra.mxu1 %v536_v21  ;;  %716 = vmatprep.subr.bf16.mxu0 %v469_v22  ;;  %v371_v21 = vunpack.c.h.s8.bf16 %v207_v17  ;;  %v174_v22 = vld [vmem:[#allocation7 + $0x10] sm:$0xff] }
  0xf3   :  { %757 = vmatprep.subr.bf16.mxu1 %v533_v23  ;;  %v206_v23 = vld [vmem:[#allocation7 + $0x110] sm:$0xff]  ;;  %v306_v24 = vunpack.c.h.s8.bf16 %v174_v22  ;;  %v302_v31 = vunpack.c.l.s8.bf16 %v174_v22 }
  0xf4   :  { %v370_v25 = vunpack.c.h.s8.bf16 %v206_v23  ;;  %v366_v32 = vunpack.c.l.s8.bf16 %v206_v23 }
  0xf5   :  { %717 = vmatpush2.bf16.msra.mxu0 %v468_v27  ;;  %v303_v27 = vunpack.c.l.s8.bf16 %v175_v16 }
  0xf6   :  { %758 = vmatpush2.bf16.msra.mxu1 %v532_v28  ;;  %718 = vmatprep.subr.bf16.mxu0 %v465_v29  ;;  %v367_v28 = vunpack.c.l.s8.bf16 %v207_v17  ;;  %v203_v29 = vld [vmem:[#allocation7 + $0xf8] sm:$0xff] }
  0xf7   :  { %759 = vmatprep.subr.bf16.mxu1 %v529_v30  ;;  %v235_v30 = vld [vmem:[#allocation7 + $0x1f8] sm:$0xff] }
  0xf9   :  { %719 = vmatpush2.bf16.msra.mxu0 %v464_v33  ;;  %v363_v33 = vunpack.c.h.s8.bf16 %v203_v29 }
  0xfa   :  { %760 = vmatpush2.bf16.msra.mxu1 %v528_v34  ;;  %720 = vmatprep.subr.bf16.mxu0 %v461_v36  ;;  %v427_v34 = vunpack.c.h.s8.bf16 %v235_v30  ;;  %v202_v36 = vld [vmem:[#allocation7 + $0xf0] sm:$0xff] }
  0xfb   :  { %761 = vmatprep.subr.bf16.mxu1 %v525_v37  ;;  %v234_v37 = vld [vmem:[#allocation7 + $0x1f0] sm:$0xff]  ;;  %v362_v38 = vunpack.c.h.s8.bf16 %v202_v36  ;;  %v358_v45 = vunpack.c.l.s8.bf16 %v202_v36 }
  0xfc   :  { %v426_v39 = vunpack.c.h.s8.bf16 %v234_v37  ;;  %v422_v47 = vunpack.c.l.s8.bf16 %v234_v37 }
  0xfd   :  { %721 = vmatpush2.bf16.msra.mxu0 %v460_v40  ;;  %v359_v40 = vunpack.c.l.s8.bf16 %v203_v29 }
  0xfe   :  { %762 = vmatpush2.bf16.msra.mxu1 %v524_v42  ;;  %772 = vmatprep.subr.bf16.mxu0 %v331_v43  ;;  %v423_v42 = vunpack.c.l.s8.bf16 %v235_v30  ;;  %v199_v43 = vld [vmem:[#allocation7 + $0xd8] sm:$0xff] }
  0xff   :  { %813 = vmatprep.subr.bf16.mxu1 %v395_v44  ;;  %v231_v44 = vld [vmem:[#allocation7 + $0x1d8] sm:$0xff] }
 0x100   :  { %723 = vmatmul.mubr.bf16.vlgmr.msra.gmra.mxu0 %v3042_v48 }
 0x101   :  { %764 = vmatmul.mubr.bf16.vlgmr.msra.gmra.mxu1 %v3046_v49  ;;  %773 = vmatpush1.bf16.msra.mxu0 %v330_v50  ;;  %v355_v50 = vunpack.c.h.s8.bf16 %v199_v43 }
 0x102   :  { %814 = vmatpush1.bf16.msra.mxu1 %v394_v51  ;;  %774 = vmatprep.subr.bf16.mxu0 %v327_v56  ;;  %v419_v51 = vunpack.c.h.s8.bf16 %v231_v44  ;;  %v198_v56 = vld [vmem:[#allocation7 + $0xd0] sm:$0xff] }
 0x103   :  { %815 = vmatprep.subr.bf16.mxu1 %v391_v57  ;;  %804 = vmatprep.mubr.bf16.mxu0 %v3006_v53  ;;  %v379_v53 = vunpack.c.h.s8.bf16 %v211_v7  ;;  %v230_v57 = vld [vmem:[#allocation7 + $0x1d0] sm:$0xff]  ;;  %v354_v58 = vunpack.c.h.s8.bf16 %v198_v56  ;;  %v350_v62 = vunpack.c.l.s8.bf16 %v198_v56 }
 0x104   :  { %845 = vmatprep.mubr.bf16.mxu1 %v3011_v55  ;;  %v210_v55 = vld [vmem:[#allocation7 + $0x130] sm:$0xff]  ;;  %v418_v59 = vunpack.c.h.s8.bf16 %v230_v57  ;;  %v414_v63 = vunpack.c.l.s8.bf16 %v230_v57 }
 0x105   :  { %775 = vmatpush1.bf16.msra.mxu0 %v326_v52  ;;  %v378_v13 = vunpack.c.h.s8.bf16 %v210_v55  ;;  %v374_v19 = vunpack.c.l.s8.bf16 %v210_v55  ;;  %v351_v52 = vunpack.c.l.s8.bf16 %v199_v43  ;;  %v242_v57 = vld [vmem:[#allocation7 + $0x230] sm:$0xff] }
 0x106   :  { %816 = vmatpush1.bf16.msra.mxu1 %v390_v60  ;;  %776 = vmatprep.subr.bf16.mxu0 %v323_v54  ;;  %v415_v60 = vunpack.c.l.s8.bf16 %v231_v44  ;;  %v195_v54 = vld [vmem:[#allocation7 + $0xb8] sm:$0xff] }
 0x107   :  { %817 = vmatprep.subr.bf16.mxu1 %v387_v61  ;;  %v227_v61 = vld [vmem:[#allocation7 + $0x1b8] sm:$0xff] }
 0x109   :  { %777 = vmatpush1.bf16.msra.mxu0 %v322_v2  ;;  %v347_v2 = vunpack.c.h.s8.bf16 %v195_v54 }
 0x10a   :  { %818 = vmatpush1.bf16.msra.mxu1 %v386_v3  ;;  %778 = vmatprep.subr.bf16.mxu0 %v319_v4  ;;  %v411_v3 = vunpack.c.h.s8.bf16 %v227_v61  ;;  %v194_v4 = vld [vmem:[#allocation7 + $0xb0] sm:$0xff] }
 0x10b   :  { %819 = vmatprep.subr.bf16.mxu1 %v383_v5  ;;  %v226_v5 = vld [vmem:[#allocation7 + $0x1b0] sm:$0xff]  ;;  %v346_v6 = vunpack.c.h.s8.bf16 %v194_v4  ;;  %v342_v11 = vunpack.c.l.s8.bf16 %v194_v4 }
 0x10c   :  { %v410_v7 = vunpack.c.h.s8.bf16 %v226_v5  ;;  %v406_v55 = vunpack.c.l.s8.bf16 %v226_v5  ;;  %v238_v4 = vld [vmem:[#allocation7 + $0x210] sm:$0xff] }
 0x10d   :  { %779 = vmatpush1.bf16.msra.mxu0 %v318_v41  ;;  %v343_v41 = vunpack.c.l.s8.bf16 %v195_v54  ;;  %v239_v54 = vld [vmem:[#allocation7 + $0x218] sm:$0xff]  ;;  %v270_v5 = vld [vmem:[#allocation7 + $0x310] sm:$0xff] }
 0x10e   :  { %820 = vmatpush1.bf16.msra.mxu1 %v382_v46  ;;  %780 = vmatprep.subr.bf16.mxu0 %v315_v10  ;;  %v407_v46 = vunpack.c.l.s8.bf16 %v227_v61  ;;  %v191_v10 = vld [vmem:[#allocation7 + $0x98] sm:$0xff] }
 0x10f   :  { %821 = vmatprep.subr.bf16.mxu1 %v379_v53  ;;  %v223_v53 = vld [vmem:[#allocation7 + $0x198] sm:$0xff] }
 0x110   :  { %v271_v61 = vld [vmem:[#allocation7 + $0x318] sm:$0xff] }
 0x111   :  { %781 = vmatpush1.bf16.msra.mxu0 %v314_v12  ;;  %v339_v12 = vunpack.c.h.s8.bf16 %v191_v10 }
 0x112   :  { %822 = vmatpush1.bf16.msra.mxu1 %v378_v13  ;;  %782 = vmatprep.subr.bf16.mxu0 %v311_v14  ;;  %v403_v13 = vunpack.c.h.s8.bf16 %v223_v53  ;;  %v190_v14 = vld [vmem:[#allocation7 + $0x90] sm:$0xff] }
 0x113   :  { %823 = vmatprep.subr.bf16.mxu1 %v375_v15  ;;  %v222_v15 = vld [vmem:[#allocation7 + $0x190] sm:$0xff]  ;;  %v338_v16 = vunpack.c.h.s8.bf16 %v190_v14  ;;  %v334_v22 = vunpack.c.l.s8.bf16 %v190_v14 }
 0x114   :  { %v402_v17 = vunpack.c.h.s8.bf16 %v222_v15  ;;  %v398_v23 = vunpack.c.l.s8.bf16 %v222_v15  ;;  %v266_v14 = vld [vmem:[#allocation7 + $0x2f0] sm:$0xff] }
 0x115   :  { %783 = vmatpush1.bf16.msra.mxu0 %v310_v18  ;;  %v335_v18 = vunpack.c.l.s8.bf16 %v191_v10  ;;  %v267_v10 = vld [vmem:[#allocation7 + $0x2f8] sm:$0xff]  ;;  %v298_v15 = vld [vmem:[#allocation7 + $0x3f0] sm:$0xff] }
 0x116   :  { %824 = vmatpush1.bf16.msra.mxu1 %v374_v19  ;;  %784 = vmatprep.subr.bf16.mxu0 %v307_v20  ;;  %v399_v19 = vunpack.c.l.s8.bf16 %v223_v53  ;;  %v251_v20 = vld [vmem:[#allocation7 + $0x278] sm:$0xff] }
 0x117   :  { %825 = vmatprep.subr.bf16.mxu1 %v371_v21  ;;  %v283_v21 = vld [vmem:[#allocation7 + $0x378] sm:$0xff] }
 0x118   :  { %v299_v53 = vld [vmem:[#allocation7 + $0x3f8] sm:$0xff] }
 0x119   :  { %785 = vmatpush1.bf16.msra.mxu0 %v306_v24  ;;  %v459_v24 = vunpack.c.h.s8.bf16 %v251_v20 }
 0x11a   :  { %826 = vmatpush1.bf16.msra.mxu1 %v370_v25  ;;  %786 = vmatprep.subr.bf16.mxu0 %v303_v27  ;;  %v523_v25 = vunpack.c.h.s8.bf16 %v283_v21  ;;  %v250_v27 = vld [vmem:[#allocation7 + $0x270] sm:$0xff] }
 0x11b   :  { %827 = vmatprep.subr.bf16.mxu1 %v367_v28  ;;  %v282_v28 = vld [vmem:[#allocation7 + $0x370] sm:$0xff]  ;;  %v458_v29 = vunpack.c.h.s8.bf16 %v250_v27  ;;  %v454_v36 = vunpack.c.l.s8.bf16 %v250_v27 }
 0x11c   :  { %v522_v30 = vunpack.c.h.s8.bf16 %v282_v28  ;;  %v518_v37 = vunpack.c.l.s8.bf16 %v282_v28  ;;  %v262_v27 = vld [vmem:[#allocation7 + $0x2d0] sm:$0xff] }
 0x11d   :  { %787 = vmatpush1.bf16.msra.mxu0 %v302_v31  ;;  %v455_v31 = vunpack.c.l.s8.bf16 %v251_v20  ;;  %v263_v20 = vld [vmem:[#allocation7 + $0x2d8] sm:$0xff]  ;;  %v294_v28 = vld [vmem:[#allocation7 + $0x3d0] sm:$0xff] }
 0x11e   :  { %828 = vmatpush1.bf16.msra.mxu1 %v366_v32  ;;  %788 = vmatprep.subr.bf16.mxu0 %v363_v33  ;;  %v519_v32 = vunpack.c.l.s8.bf16 %v283_v21  ;;  %v247_v33 = vld [vmem:[#allocation7 + $0x258] sm:$0xff] }
 0x11f   :  { %829 = vmatprep.subr.bf16.mxu1 %v427_v34  ;;  %v279_v34 = vld [vmem:[#allocation7 + $0x358] sm:$0xff] }
 0x120   :  { %v511_v44 = vunpack.c.l.s8.bf16 %v279_v34  ;;  %v295_v21 = vld [vmem:[#allocation7 + $0x3d8] sm:$0xff] }
 0x121   :  { %789 = vmatpush2.bf16.msra.mxu0 %v362_v38  ;;  %v451_v38 = vunpack.c.h.s8.bf16 %v247_v33 }
 0x122   :  { %830 = vmatpush2.bf16.msra.mxu1 %v426_v39  ;;  %790 = vmatprep.subr.bf16.mxu0 %v359_v40  ;;  %v515_v39 = vunpack.c.h.s8.bf16 %v279_v34  ;;  %v246_v40 = vld [vmem:[#allocation7 + $0x250] sm:$0xff]  ;;  %v291_v34 = vld [vmem:[#allocation7 + $0x3b8] sm:$0xff] }
 0x123   :  { %831 = vmatprep.subr.bf16.mxu1 %v423_v42  ;;  %v278_v42 = vld [vmem:[#allocation7 + $0x350] sm:$0xff]  ;;  %v450_v43 = vunpack.c.h.s8.bf16 %v246_v40 }
 0x125   :  { %791 = vmatpush2.bf16.msra.mxu0 %v358_v45  ;;  %v243_v45 = vld [vmem:[#allocation7 + $0x238] sm:$0xff] }
 0x126   :  { %832 = vmatpush2.bf16.msra.mxu1 %v422_v47  ;;  %792 = vmatprep.subr.bf16.mxu0 %v355_v50  ;;  %v275_v47 = vld [vmem:[#allocation7 + $0x338] sm:$0xff]  ;;  %v446_v50 = vunpack.c.l.s8.bf16 %v246_v40  ;;  %v443_v56 = vunpack.c.h.s8.bf16 %v243_v45  ;;  %v258_v40 = vld [vmem:[#allocation7 + $0x2b0] sm:$0xff] }
 0x127   :  { %833 = vmatprep.subr.bf16.mxu1 %v419_v51  ;;  %v510_v51 = vunpack.c.l.s8.bf16 %v278_v42 }
 0x129   :  { %793 = vmatpush2.bf16.msra.mxu0 %v354_v58  ;;  %v442_v58 = vunpack.c.h.s8.bf16 %v242_v57 }
 0x12a   :  { %834 = vmatpush2.bf16.msra.mxu1 %v418_v59  ;;  %794 = vmatprep.subr.bf16.mxu0 %v351_v52  ;;  %v439_v52 = vunpack.c.l.s8.bf16 %v243_v45  ;;  %v255_v45 = vld [vmem:[#allocation7 + $0x298] sm:$0xff] }
 0x12b   :  { %835 = vmatprep.subr.bf16.mxu1 %v415_v60  ;;  %v503_v60 = vunpack.c.l.s8.bf16 %v275_v47 }
 0x12d   :  { %795 = vmatpush2.bf16.msra.mxu0 %v350_v62  ;;  %v438_v62 = vunpack.c.l.s8.bf16 %v242_v57  ;;  %v254_v57 = vld [vmem:[#allocation7 + $0x290] sm:$0xff] }
 0x12e   :  { %836 = vmatpush2.bf16.msra.mxu1 %v414_v63  ;;  %796 = vmatprep.subr.bf16.mxu0 %v347_v2  ;;  %v435_v2 = vunpack.c.h.s8.bf16 %v239_v54 }
 0x12f   :  { %837 = vmatprep.subr.bf16.mxu1 %v411_v3  ;;  %v499_v3 = vunpack.c.h.s8.bf16 %v271_v61 }
 0x131   :  { %797 = vmatpush2.bf16.msra.mxu0 %v346_v6  ;;  %v434_v6 = vunpack.c.h.s8.bf16 %v238_v4 }
 0x132   :  { %838 = vmatpush2.bf16.msra.mxu1 %v410_v7  ;;  %798 = vmatprep.subr.bf16.mxu0 %v343_v41  ;;  %v498_v7 = vunpack.c.h.s8.bf16 %v270_v5  ;;  %v431_v41 = vunpack.c.l.s8.bf16 %v239_v54  ;;  %v462_v54 = vunpack.c.l.s8.bf16 %v254_v57 }
 0x133   :  { %839 = vmatprep.subr.bf16.mxu1 %v407_v46  ;;  %v495_v46 = vunpack.c.l.s8.bf16 %v271_v61 }
 0x135   :  { %799 = vmatpush2.bf16.msra.mxu0 %v342_v11  ;;  %v430_v11 = vunpack.c.l.s8.bf16 %v238_v4 }
 0x136   :  { %840 = vmatpush2.bf16.msra.mxu1 %v406_v55  ;;  %800 = vmatprep.subr.bf16.mxu0 %v339_v12  ;;  %v494_v55 = vunpack.c.l.s8.bf16 %v270_v5  ;;  %v491_v12 = vunpack.c.h.s8.bf16 %v267_v10 }
 0x137   :  { %841 = vmatprep.subr.bf16.mxu1 %v403_v13  ;;  %v555_v13 = vunpack.c.h.s8.bf16 %v299_v53 }
 0x139   :  { %801 = vmatpush2.bf16.msra.mxu0 %v338_v16  ;;  %v490_v16 = vunpack.c.h.s8.bf16 %v266_v14 }
 0x13a   :  { %842 = vmatpush2.bf16.msra.mxu1 %v402_v17  ;;  %802 = vmatprep.subr.bf16.mxu0 %v335_v18  ;;  %v554_v17 = vunpack.c.h.s8.bf16 %v298_v15  ;;  %v487_v18 = vunpack.c.l.s8.bf16 %v267_v10 }
 0x13b   :  { %843 = vmatprep.subr.bf16.mxu1 %v399_v19  ;;  %v551_v19 = vunpack.c.l.s8.bf16 %v299_v53 }
 0x13d   :  { %803 = vmatpush2.bf16.msra.mxu0 %v334_v22  ;;  %v486_v22 = vunpack.c.l.s8.bf16 %v266_v14  ;;  %v2566_v14 = vld [vmem:[#allocation11 + $0xf8] sm:$0xff]  }
 0x13e   :  { %844 = vmatpush2.bf16.msra.mxu1 %v398_v23  ;;  %854 = vmatprep.subr.bf16.mxu0 %v459_v24  ;;  %v550_v23 = vunpack.c.l.s8.bf16 %v298_v15  ;;  %v483_v24 = vunpack.c.h.s8.bf16 %v263_v20  ;;  %v2567_v15 = vld [vmem:[#allocation11 + $0xb8] sm:$0xff]  }
 0x13f   :  { %895 = vmatprep.subr.bf16.mxu1 %v523_v25  ;;  %v547_v25 = vunpack.c.h.s8.bf16 %v295_v21 }
 0x140   :  { %805 = vmatmul.mubr.bf16.vlgmr.msra.gmra.mxu0 %v3026_v0  ;;  %v514_v0 = vunpack.c.h.s8.bf16 %v278_v42  ;;  %v290_v42 = vld [vmem:[#allocation7 + $0x3b0] sm:$0xff] }
 0x141   :  { %846 = vmatmul.mubr.bf16.vlgmr.msra.gmra.mxu1 %v3030_v1  ;;  %855 = vmatpush1.bf16.msra.mxu0 %v458_v29  ;;  %v447_v1 = vunpack.c.l.s8.bf16 %v247_v33  ;;  %v482_v29 = vunpack.c.h.s8.bf16 %v262_v27  ;;  %v259_v33 = vld [vmem:[#allocation7 + $0x2b8] sm:$0xff] }
 0x142   :  { %896 = vmatpush1.bf16.msra.mxu1 %v522_v30  ;;  %856 = vmatprep.subr.bf16.mxu0 %v455_v31  ;;  %v546_v30 = vunpack.c.h.s8.bf16 %v294_v28  ;;  %v479_v31 = vunpack.c.l.s8.bf16 %v263_v20  ;;  %v2571_v20 = vld [vmem:[#allocation11 + $0xa8] sm:$0xff]  }
 0x143   :  { %897 = vmatprep.subr.bf16.mxu1 %v519_v32  ;;  %886 = vmatprep.mubr.bf16.mxu0 %v3032_v8  ;;  %v507_v8 = vunpack.c.h.s8.bf16 %v275_v47  ;;  %v543_v32 = vunpack.c.l.s8.bf16 %v295_v21  ;;  %v287_v47 = vld [vmem:[#allocation7 + $0x398] sm:$0xff] }
 0x144   :  { %927 = vmatprep.mubr.bf16.mxu1 %v3034_v9  ;;  %v274_v9 = vld [vmem:[#allocation7 + $0x330] sm:$0xff]  ;;  %v2560_v21 = vld [vmem:[#allocation11 + $0x50] sm:$0xff]  }
 0x145   :  { %857 = vmatpush1.bf16.msra.mxu0 %v454_v36  ;;  %v506_v59 = vunpack.c.h.s8.bf16 %v274_v9  ;;  %v502_v63 = vunpack.c.l.s8.bf16 %v274_v9  ;;  %v478_v36 = vunpack.c.l.s8.bf16 %v262_v27  ;;  %v286_v9 = vld [vmem:[#allocation7 + $0x390] sm:$0xff] }
 0x146   :  { %898 = vmatpush1.bf16.msra.mxu1 %v518_v37  ;;  %858 = vmatprep.subr.bf16.mxu0 %v451_v38  ;;  %v542_v37 = vunpack.c.l.s8.bf16 %v294_v28  ;;  %v475_v38 = vunpack.c.h.s8.bf16 %v259_v33  ;;  %v526_v61 = vunpack.c.l.s8.bf16 %v286_v9  ;;  %v2563_v27 = vld [vmem:[#allocation11 + $0x8] sm:$0xff]   ;;  %v2564_v28 = vld [vmem:[#allocation11 + $0x40] sm:$0xff]  }
 0x147   :  { %899 = vmatprep.subr.bf16.mxu1 %v515_v39  ;;  %v539_v39 = vunpack.c.h.s8.bf16 %v291_v34 }
 0x149   :  { %859 = vmatpush1.bf16.msra.mxu0 %v450_v43  ;;  %v474_v43 = vunpack.c.h.s8.bf16 %v258_v40 }
 0x14a   :  { %900 = vmatpush1.bf16.msra.mxu1 %v514_v0  ;;  %860 = vmatprep.subr.bf16.mxu0 %v447_v1  ;;  %v538_v0 = vunpack.c.h.s8.bf16 %v290_v42  ;;  %v471_v1 = vunpack.c.l.s8.bf16 %v259_v33  ;;  %v3064_v33 = vsub.s32 1, %v2993_v26 }
 0x14b   :  { %901 = vmatprep.subr.bf16.mxu1 %v511_v44  ;;  %v535_v44 = vunpack.c.l.s8.bf16 %v291_v34  ;;  %v2575_v34 = vld [vmem:[#allocation11 + $0x98] sm:$0xff]  }
 0x14d   :  { %861 = vmatpush1.bf16.msra.mxu0 %v446_v50  ;;  %v470_v50 = vunpack.c.l.s8.bf16 %v258_v40 }
 0x14e   :  { %902 = vmatpush1.bf16.msra.mxu1 %v510_v51  ;;  %862 = vmatprep.subr.bf16.mxu0 %v443_v56  ;;  %v534_v51 = vunpack.c.l.s8.bf16 %v290_v42  ;;  %v467_v56 = vunpack.c.h.s8.bf16 %v255_v45 }
 0x14f   :  { %903 = vmatprep.subr.bf16.mxu1 %v507_v8  ;;  %v531_v8 = vunpack.c.h.s8.bf16 %v287_v47 }
 0x151   :  { %863 = vmatpush1.bf16.msra.mxu0 %v442_v58  ;;  %v466_v58 = vunpack.c.h.s8.bf16 %v254_v57 }
 0x152   :  { %904 = vmatpush1.bf16.msra.mxu1 %v506_v59  ;;  %864 = vmatprep.subr.bf16.mxu0 %v439_v52  ;;  %v530_v59 = vunpack.c.h.s8.bf16 %v286_v9  ;;  %v463_v52 = vunpack.c.l.s8.bf16 %v255_v45 }
 0x153   :  { %905 = vmatprep.subr.bf16.mxu1 %v503_v60  ;;  %v527_v60 = vunpack.c.l.s8.bf16 %v287_v47 }
 0x155   :  { %865 = vmatpush1.bf16.msra.mxu0 %v438_v62  ;;  %v2550_v62 = vld [vmem:[#allocation11 + $0x78] sm:$0xff]  }
 0x156   :  { %906 = vmatpush1.bf16.msra.mxu1 %v502_v63  ;;  %866 = vmatprep.subr.bf16.mxu0 %v435_v2  ;;  %v2551_v63 = vld [vmem:[#allocation11 + $0x38] sm:$0xff]   ;;  %v2552_v2 = vld [vmem:[#allocation11 + $0x70] sm:$0xff]  }
 0x157   :  { %907 = vmatprep.subr.bf16.mxu1 %v499_v3 }
 0x159   :  { %867 = vmatpush1.bf16.msra.mxu0 %v434_v6  ;;  %v2553_v6 = vld [vmem:[#allocation11 + $0x30] sm:$0xff]  }
 0x15a   :  { %908 = vmatpush1.bf16.msra.mxu1 %v498_v7  ;;  %868 = vmatprep.subr.bf16.mxu0 %v431_v41 }
 0x15b   :  { %909 = vmatprep.subr.bf16.mxu1 %v495_v46  ;;  %v2554_v46 = vld [vmem:[#allocation11 + $0x68] sm:$0xff]  }
 0x15d   :  { %869 = vmatpush1.bf16.msra.mxu0 %v430_v11  ;;  %v2555_v11 = vld [vmem:[#allocation11 + $0x28] sm:$0xff]  }
 0x15e   :  { %910 = vmatpush1.bf16.msra.mxu1 %v494_v55  ;;  %870 = vmatprep.subr.bf16.mxu0 %v491_v12  ;;  %v2556_v55 = vld [vmem:[#allocation11 + $0x60] sm:$0xff]  }
 0x15f   :  { %911 = vmatprep.subr.bf16.mxu1 %v555_v13 }
 0x161   :  { %871 = vmatpush2.bf16.msra.mxu0 %v490_v16  ;;  %v2569_v16 = vld [vmem:[#allocation11 + $0xb0] sm:$0xff]  }
 0x162   :  { %912 = vmatpush2.bf16.msra.mxu1 %v554_v17  ;;  %872 = vmatprep.subr.bf16.mxu0 %v487_v18  ;;  %v2558_v17 = vld [vmem:[#allocation11 + $0x58] sm:$0xff]   ;;  %v2570_v18 = vld [vmem:[#allocation11 + $0xe8] sm:$0xff]  }
 0x163   :  { %913 = vmatprep.subr.bf16.mxu1 %v551_v19  ;;  %v2559_v19 = vld [vmem:[#allocation11 + $0x18] sm:$0xff]  }
 0x165   :  { %873 = vmatpush2.bf16.msra.mxu0 %v486_v22  ;;  %v2572_v22 = vld [vmem:[#allocation11 + $0xe0] sm:$0xff]  }
 0x166   :  { %914 = vmatpush2.bf16.msra.mxu1 %v550_v23  ;;  %874 = vmatprep.subr.bf16.mxu0 %v483_v24  ;;  %v2561_v23 = vld [vmem:[#allocation11 + $0x10] sm:$0xff]   ;;  %v2573_v24 = vld [vmem:[#allocation11 + $0xa0] sm:$0xff]  }
 0x167   :  { %915 = vmatprep.subr.bf16.mxu1 %v547_v25  ;;  %v2562_v25 = vld [vmem:[#allocation11 + $0x48] sm:$0xff]  }
 0x169   :  { %875 = vmatpush2.bf16.msra.mxu0 %v482_v29  ;;  %v2565_v29 = vld [vmem:[#allocation11] sm:$0xff]  }
 0x16a   :  { %916 = vmatpush2.bf16.msra.mxu1 %v546_v30  ;;  %876 = vmatprep.subr.bf16.mxu0 %v479_v31  ;;  %v3059_v30 = vsub.s32 0, %v2993_v26  ;;  %v3061_v31 = vld [vmem:[#allocation8] sm:$0xf] }
 0x16b   :  { %917 = vmatprep.subr.bf16.mxu1 %v543_v32  ;;  %v2574_v32 = vld [vmem:[#allocation11 + $0xd8] sm:$0xff]  }
 0x16c   :  { %v941_v42 = vrot.slane %v3061_v31, %v3059_v30 }
 0x16d   :  { %877 = vmatpush2.bf16.msra.mxu0 %v478_v36 }
 0x16e   :  { %918 = vmatpush2.bf16.msra.mxu1 %v542_v37  ;;  %878 = vmatprep.subr.bf16.mxu0 %v475_v38  ;;  %v3066_v38 = vld [vmem:[#allocation10] sm:$0xf] }
 0x16f   :  { %919 = vmatprep.subr.bf16.mxu1 %v539_v39  ;;  %v967_v45 = vrot.slane %v3066_v38, %v3059_v30 }
 0x171   :  { %879 = vmatpush2.bf16.msra.mxu0 %v474_v43 }
 0x172   :  { %920 = vmatpush2.bf16.msra.mxu1 %v538_v0  ;;  %880 = vmatprep.subr.bf16.mxu0 %v471_v1  ;;  %v2576_v1 = vld [vmem:[#allocation11 + $0xd0] sm:$0xff]  }
 0x173   :  { %921 = vmatprep.subr.bf16.mxu1 %v535_v44 }
 0x175   :  { %881 = vmatpush2.bf16.msra.mxu0 %v470_v50  ;;  %v945_v50 = vrot.slane %v3061_v31, %v3064_v33 }
 0x176   :  { %922 = vmatpush2.bf16.msra.mxu1 %v534_v51  ;;  %882 = vmatprep.subr.bf16.mxu0 %v467_v56  ;;  %v2577_v51 = vld [vmem:[#allocation11 + $0x90] sm:$0xff]  }
 0x177   :  { %923 = vmatprep.subr.bf16.mxu1 %v531_v8 }
 0x179   :  { %883 = vmatpush2.bf16.msra.mxu0 %v466_v58  ;;  %v971_v58 = vrot.slane %v3066_v38, %v3064_v33 }
 0x17a   :  { %924 = vmatpush2.bf16.msra.mxu1 %v530_v59  ;;  %884 = vmatprep.subr.bf16.mxu0 %v463_v52 }
 0x17b   :  { %925 = vmatprep.subr.bf16.mxu1 %v527_v60  ;;  %v2578_v60 = vld [vmem:[#allocation11 + $0xc8] sm:$0xff]  }
 0x17d   :  { %885 = vmatpush2.bf16.msra.mxu0 %v462_v54 }
 0x17e   :  { %926 = vmatpush2.bf16.msra.mxu1 %v526_v61  ;;  %2482 = vmatprep.subr.bf16.mxu0 %v2550_v62  ;;  %v2579_v62 = vld [vmem:[#allocation11 + $0x88] sm:$0xff]  }
 0x17f   :  { %2504 = vmatprep.subr.bf16.mxu1 %v2566_v14 }
 0x180   :  { %v642_v3 = vpop.f32.mrf.mxu0  ;;  %887 = vmatmul.mubr.bf16.vlgmr.msra.gmra.mxu0 %v3042_v48  ;;  %v2568_v48 = vld [vmem:[#allocation11 + $0xf0] sm:$0xff]  }
 0x181   :  { %v683_v4 = vpop.f32.mrf.mxu1  ;;  %928 = vmatmul.mubr.bf16.vlgmr.msra.gmra.mxu1 %v3046_v49  ;;  %2483 = vmatpush3.bf16.msra.mxu0 %v2551_v63  ;;  %v2557_v49 = vld [vmem:[#allocation11 + $0x20] sm:$0xff]  }
 0x182   :  { %v684_v5 = vadd.f32 %v683_v4, %v642_v3  ;;  %v644_v7 = vpop.f32.mrf.mxu0  ;;  %2484 = vmatprep.subr.bf16.mxu0 %v2552_v2  ;;  %2505 = vmatpush3.bf16.msra.mxu1 %v2567_v15  ;;  %v2580_v3 = vld [vmem:[#allocation11 + $0xc0] sm:$0xff]   ;;  %v3077_v15 = vsub.s32 2, %v2993_v26 }
 0x183   :  { %v685_v41 = vpop.f32.mrf.mxu1  ;;  %2506 = vmatprep.subr.bf16.mxu1 %v2568_v48  ;;  %v3080_v48 = vsub.s32 3, %v2993_v26 }
 0x184   :  { %v646_v10 = vpop.f32.mrf.mxu0  ;;  %v686_v39 = vadd.f32 %v685_v41, %v644_v7 }
 0x185   :  { %v687_v53 = vpop.f32.mrf.mxu1  ;;  %2485 = vmatpush3.bf16.msra.mxu0 %v2553_v6 }
 0x186   :  { %v647_v12 = vpop.f32.mrf.mxu0  ;;  %2486 = vmatprep.subr.bf16.mxu0 %v2554_v46  ;;  %2507 = vmatpush3.bf16.msra.mxu1 %v2569_v16 }
 0x187   :  { %v688_v13 = vpop.f32.mrf.mxu1  ;;  %2508 = vmatprep.subr.bf16.mxu1 %v2570_v18 }
 0x189   :  { %2487 = vmatpush3.bf16.msra.mxu0 %v2555_v11 }
 0x18a   :  { %2488 = vmatprep.subr.bf16.mxu0 %v2556_v55  ;;  %2509 = vmatpush3.bf16.msra.mxu1 %v2571_v20 }
 0x18b   :  { %2510 = vmatprep.subr.bf16.mxu1 %v2572_v22 }
 0x18d   :  { %2489 = vmatpush3.bf16.msra.mxu0 %v2557_v49 }
 0x18e   :  { %2490 = vmatprep.subr.bf16.mxu0 %v2558_v17  ;;  %2511 = vmatpush3.bf16.msra.mxu1 %v2573_v24 }
 0x18f   :  { %2512 = vmatprep.subr.bf16.mxu1 %v2574_v32 }
 0x191   :  { %2491 = vmatpush3.bf16.msra.mxu0 %v2559_v19  ;;  %v949_v19 = vrot.slane %v3061_v31, %v3077_v15 }
 0x192   :  { %2492 = vmatprep.subr.bf16.mxu0 %v2560_v21  ;;  %2513 = vmatpush3.bf16.msra.mxu1 %v2575_v34  ;;  %v979_v34 = vrot.slane %v3066_v38, %v3080_v48 }
 0x193   :  { %2514 = vmatprep.subr.bf16.mxu1 %v2576_v1 }
 0x195   :  { %2493 = vmatpush3.bf16.msra.mxu0 %v2561_v23  ;;  %v975_v23 = vrot.slane %v3066_v38, %v3077_v15  ;;  %v2587_v38 = vld [vmem:[#allocation14 + $0x2c] ss:$16 sps:$4 sm:$0xff]  }
 0x196   :  { %2494 = vmatprep.subr.bf16.mxu0 %v2562_v25  ;;  %2515 = vmatpush3.bf16.msra.mxu1 %v2577_v51  ;;  %v953_v25 = vrot.slane %v3061_v31, %v3080_v48 }
 0x197   :  { %2516 = vmatprep.subr.bf16.mxu1 %v2578_v60 }
 0x199   :  { %2495 = vmatpush3.bf16.msra.mxu0 %v2563_v27 }
 0x19a   :  { %2496 = vmatprep.subr.bf16.mxu0 %v2564_v28  ;;  %2517 = vmatpush3.bf16.msra.mxu1 %v2579_v62 }
 0x19b   :  { %2518 = vmatprep.subr.bf16.mxu1 %v2580_v3  ;;  %v2590_v3 = vld [vmem:[#allocation14 + $0x4] ss:$16 sps:$4 sm:$0xff]  }
 0x19d   :  { %2497 = vmatpush3.bf16.msra.mxu0 %v2565_v29 }
 0x1c0   :  { %v724_v36 = vpop.f32.mrf.mxu0 }
 0x1c1   :  { %v765_v37 = vpop.f32.mrf.mxu1  ;;  %v725_v40 = vadd.f32 %v724_v36, %v684_v5  ;;  %v2581_v5 = vld [vmem:[#allocation11 + $0x80] sm:$0xff]  }
 0x1c2   :  { %v726_v43 = vpop.f32.mrf.mxu0  ;;  %2519 = vmatpush3.bf16.msra.mxu1 %v2581_v5  ;;  %v2588_v5 = vld [vmem:[#allocation14] ss:$16 sps:$4 sm:$0xff]  }
 0x1c3   :  { %v767_v0 = vpop.f32.mrf.mxu1  ;;  %v766_v44 = vadd.f32 %v765_v37, %v725_v40  ;;  %v727_v47 = vadd.f32 %v726_v43, %v686_v39  ;;  %1477 = vmatprep.subr.bf16.mxu1 %v2587_v38 }
 0x1c4   :  { %v728_v56 = vpop.f32.mrf.mxu0 }
 0x1c5   :  { %v769_v8 = vpop.f32.mrf.mxu1  ;;  %v958_v57 = vmul.f32 %v941_v42, %v766_v44  ;;  %v768_v9 = vadd.f32 %v767_v0, %v727_v47  ;;  %v2582_v56 = vld [vmem:[#allocation14 + $0x20] ss:$16 sps:$4 sm:$0xff]  }
 0x1c6   :  { %v729_v59 = vpop.f32.mrf.mxu0  ;;  %v2584_v8 = vld [vmem:[#allocation14 + $0x24] ss:$16 sps:$4 sm:$0xff]  }
 0x1c7   :  { %v770_v52 = vpop.f32.mrf.mxu1  ;;  %v984_v54 = vadd.f32 %v967_v45, %v958_v57  ;;  %v959_v61 = vmul.f32 %v945_v50, %v768_v9  ;;  %v2585_v57 = vld [vmem:[#allocation14 + $0x28] ss:$16 sps:$4 sm:$0xff]   ;;  %1436 = vmatprep.subr.bf16.mxu0 %v2584_v8  ;;  %v2439_v9 = vld [vmem:[#allocation13] ss:$0 sm:$0xff]  ;;  %v1511_v8 = vld [vmem:[#allocation17 + $0x8] sm:$0xff] }
 0x1c9   :  { %v985_v63 = vadd.f32 %v971_v58, %v959_v61  ;;  %v988_v2 = vmax.f32 %v984_v54, 0.0 }
 0x1cb   :  { %v989_v4 = vmax.f32 %v985_v63, 0.0  ;;  %v992_v7 = vpack.c.bf16 %v988_v2, %v988_v2 }
 0x1cd   :  { %v993_v6 = vpack.c.bf16 %v989_v4, %v989_v4  ;;  %v2593_v4 = vld [vmem:[#allocation14 + $0xc] ss:$16 sps:$4 sm:$0xff]  }
 0x1cf   :  { %1291 = vmatprep.mubr.bf16.mxu0 %v993_v6  ;;  %v2591_v6 = vld [vmem:[#allocation14 + $0x8] ss:$16 sps:$4 sm:$0xff]  }
 0x1d0   :  { %1292 = vmatmul.mubr.bf16.vlgmr.msra.gmra.mxu0 %v992_v7  ;;  %v2886_v7 = vmov 0  }
 0x1d1   :  { %1437 = vmatpush1.bf16.msra.mxu0 %v2582_v56  ;;  %1456 = vmatprep.mubr.bf16.mxu0 %v2886_v7 }
 0x1d2   :  { %1438 = vmatprep.subr.bf16.mxu0 %v2590_v3  ;;  %v1631_v3 = vld [vmem:[#allocation17 + $0x3c8] sm:$0xff] }
 0x1d5   :  { %1439 = vmatpush1.bf16.msra.mxu0 %v2588_v5 }
 0x200   :  { %v806_v41 = vpop.f32.mrf.mxu0 }
 0x201   :  { %v847_v46 = vpop.f32.mrf.mxu1 }
 0x202   :  { %v848_v10 = vadd.f32 %v847_v46, %v806_v41  ;;  %v808_v53 = vpop.f32.mrf.mxu0  ;;  %v1535_v41 = vld [vmem:[#allocation17 + $0xc8] sm:$0xff] }
 0x203   :  { %v849_v11 = vpop.f32.mrf.mxu1  ;;  %v1599_v46 = vld [vmem:[#allocation17 + $0x2c8] sm:$0xff] }
 0x204   :  { %v810_v55 = vpop.f32.mrf.mxu0  ;;  %v850_v17 = vadd.f32 %v849_v11, %v808_v53  ;;  %v1823_v53 = vunpack.c.h.s8.bf16 %v1599_v46 }
 0x205   :  { %v851_v12 = vpop.f32.mrf.mxu1  ;;  %v1339_v55 = vld [vmem:[#allocation5] sm:$0x3] }
 0x206   :  { %v811_v13 = vpop.f32.mrf.mxu0 }
 0x207   :  { %v852_v14 = vpop.f32.mrf.mxu1 }
 0x208   :  { %v1534_v14 = vld [vmem:[#allocation17 + $0xc0] sm:$0xff] }
 0x240   :  { %v888_v49 = vpop.f32.mrf.mxu0 }
 0x241   :  { %v929_v16 = vpop.f32.mrf.mxu1  ;;  %v889_v18 = vadd.f32 %v888_v49, %v848_v10  ;;  %v1695_v10 = vunpack.c.h.s8.bf16 %v1535_v41  ;;  %v1598_v49 = vld [vmem:[#allocation17 + $0x2c0] sm:$0xff] }
 0x242   :  { %v890_v20 = vpop.f32.mrf.mxu0 }
 0x243   :  { %v931_v21 = vpop.f32.mrf.mxu1  ;;  %v930_v22 = vadd.f32 %v929_v16, %v889_v18  ;;  %v891_v24 = vadd.f32 %v890_v20, %v850_v17  ;;  %1898 = vmatprep.subr.bf16.mxu0 %v1695_v10  ;;  %v1694_v17 = vunpack.c.h.s8.bf16 %v1534_v14  ;;  %v1822_v18 = vunpack.c.h.s8.bf16 %v1598_v49 }
 0x244   :  { %v892_v27 = vpop.f32.mrf.mxu0  ;;  %v1687_v20 = vunpack.c.l.s8.bf16 %v1535_v41  ;;  %v1566_v41 = vld [vmem:[#allocation17 + $0x1c0] sm:$0xff] }
 0x245   :  { %v933_v28 = vpop.f32.mrf.mxu1  ;;  %v960_v29 = vmul.f32 %v949_v19, %v930_v22  ;;  %v932_v32 = vadd.f32 %v931_v21, %v891_v24  ;;  %v1815_v21 = vunpack.c.l.s8.bf16 %v1599_v46  ;;  %v1527_v22 = vld [vmem:[#allocation17 + $0x88] sm:$0xff]  ;;  %v1686_v24 = vunpack.c.l.s8.bf16 %v1534_v14  ;;  %v1630_v46 = vld [vmem:[#allocation17 + $0x3c0] sm:$0xff] }
 0x246   :  { %v893_v36 = vpop.f32.mrf.mxu0  ;;  %v1679_v27 = vunpack.c.h.s8.bf16 %v1527_v22  ;;  %v1758_v10 = vunpack.c.h.s8.bf16 %v1566_v41  ;;  %v1750_v14 = vunpack.c.l.s8.bf16 %v1566_v41 }
 0x247   :  { %v934_v37 = vpop.f32.mrf.mxu1  ;;  %v986_v39 = vadd.f32 %v975_v23, %v960_v29  ;;  %v961_v40 = vmul.f32 %v953_v25, %v932_v32  ;;  %v1591_v23 = vld [vmem:[#allocation17 + $0x288] sm:$0xff]  ;;  %v1814_v25 = vunpack.c.l.s8.bf16 %v1598_v49  ;;  %v1526_v29 = vld [vmem:[#allocation17 + $0x80] sm:$0xff]  ;;  %v1878_v49 = vunpack.c.l.s8.bf16 %v1630_v46 }
 0x248   :  { %v1807_v28 = vunpack.c.h.s8.bf16 %v1591_v23  ;;  %v1590_v32 = vld [vmem:[#allocation17 + $0x280] sm:$0xff]  ;;  %v1671_v37 = vunpack.c.l.s8.bf16 %v1527_v22 }
 0x249   :  { %v987_v42 = vadd.f32 %v979_v34, %v961_v40  ;;  %v990_v43 = vmax.f32 %v986_v39, 0.0  ;;  %v1678_v34 = vunpack.c.h.s8.bf16 %v1526_v29  ;;  %v1806_v36 = vunpack.c.h.s8.bf16 %v1590_v32  ;;  %v1519_v40 = vld [vmem:[#allocation17 + $0x48] sm:$0xff] }
 0x24a   :  { %v1799_v39 = vunpack.c.l.s8.bf16 %v1591_v23 }
 0x24b   :  { %v991_v0 = vmax.f32 %v987_v42, 0.0  ;;  %v994_v44 = vpack.c.bf16 %v990_v43, %v990_v43  ;;  %v1583_v42 = vld [vmem:[#allocation17 + $0x248] sm:$0xff]  ;;  %v1670_v43 = vunpack.c.l.s8.bf16 %v1526_v29 }
 0x24c   :  { %v1783_v56 = vunpack.c.l.s8.bf16 %v1583_v42 }
 0x24d   :  { %v995_v1 = vpack.c.bf16 %v991_v0, %v991_v0  ;;  %v1798_v0 = vunpack.c.l.s8.bf16 %v1590_v32 }
 0x24f   :  { %1331 = vmatprep.mubr.bf16.mxu1 %v995_v1  ;;  %v1663_v1 = vunpack.c.h.s8.bf16 %v1519_v40 }
 0x250   :  { %1332 = vmatmul.mubr.bf16.vlgmr.msra.gmra.mxu1 %v994_v44  ;;  %v1791_v44 = vunpack.c.h.s8.bf16 %v1583_v42 }
 0x251   :  { %1478 = vmatpush1.bf16.msra.mxu1 %v2585_v57  ;;  %1497 = vmatprep.mubr.bf16.mxu1 %v2886_v7  ;;  %v1575_v57 = vld [vmem:[#allocation17 + $0x208] sm:$0xff]  ;;  %v1887_v7 = vunpack.c.h.s8.bf16 %v1631_v3 }
 0x252   :  { %1479 = vmatprep.subr.bf16.mxu1 %v2593_v4 }
 0x255   :  { %1480 = vmatpush1.bf16.msra.mxu1 %v2591_v6 }
 0x256   :  { %1939 = vmatprep.subr.bf16.mxu1 %v1823_v53  ;;  %v1886_v53 = vunpack.c.h.s8.bf16 %v1630_v46 }
 0x290   :  { %v2498_v45 = vpop.f32.mrf.mxu0 }
 0x292   :  { %v2499_v31 = vpop.f32.mrf.mxu0 }
 0x293   :  { %v2500_v47 = vadd.f32 %v2499_v31, %v2498_v45  ;;  %v1518_v45 = vld [vmem:[#allocation17 + $0x40] sm:$0xff] }
 0x294   :  { %v2501_v50 = vpop.f32.mrf.mxu0  ;;  %v1582_v31 = vld [vmem:[#allocation17 + $0x240] sm:$0xff]  ;;  %v1654_v38 = vunpack.c.l.s8.bf16 %v1518_v45 }
 0x295   :  { %v1294_v52 = vadd.f32 %v2500_v47, %v2439_v9  ;;  %v1662_v47 = vunpack.c.h.s8.bf16 %v1518_v45  ;;  %v1790_v50 = vunpack.c.h.s8.bf16 %v1582_v31  ;;  %v1782_v9 = vunpack.c.l.s8.bf16 %v1582_v31 }
 0x296   :  { %v2502_v51 = vpop.f32.mrf.mxu0 }
 0x297   :  { %v1655_v51 = vunpack.c.l.s8.bf16 %v1519_v40 }
 0x310   :  { %v2520_v58 = vpop.f32.mrf.mxu1 }
 0x312   :  { %v2521_v59 = vpop.f32.mrf.mxu1 }
 0x313   :  { %v2522_v60 = vadd.f32 %v2521_v59, %v2520_v58  ;;  %v1647_v58 = vunpack.c.h.s8.bf16 %v1511_v8  ;;  %v1775_v59 = vunpack.c.h.s8.bf16 %v1575_v57 }
 0x314   :  { %v2523_v54 = vpop.f32.mrf.mxu1 }
 0x315   :  { %v1334_v61 = vadd.f32 %v2522_v60, %v1294_v52  ;;  %v1510_v52 = vld [vmem:[#allocation17] sm:$0xff] }
 0x316   :  { %v2524_v62 = vpop.f32.mrf.mxu1  ;;  %v1574_v60 = vld [vmem:[#allocation17 + $0x200] sm:$0xff]  ;;  %v1646_v54 = vunpack.c.h.s8.bf16 %v1510_v52  ;;  %v1638_v4 = vunpack.c.l.s8.bf16 %v1510_v52 }
 0x317   :  { %v1340_v63 = vmul.f32 0.5, %v1334_v61  ;;  %2404 = vst [vmem:[#allocation20] sm:$0x3] %v1334_v61  ;;  %v1639_v62 = vunpack.c.l.s8.bf16 %v1511_v8  ;;  %v1766_v5 = vunpack.c.l.s8.bf16 %v1574_v60 }
 0x319   :  { %v1341_v2 = vmul.f32 1.442695, %v1340_v63  ;;  %v1767_v63 = vunpack.c.l.s8.bf16 %v1575_v57 }
 0x31b   :  { %2594 = vpow2.f32 %v1341_v2  ;;  %v1567_v2 = vld [vmem:[#allocation17 + $0x1c8] sm:$0xff] }
 0x31c   :  { %v1759_v6 = vunpack.c.h.s8.bf16 %v1567_v2 }
 0x328   :  { %v2595_v11 = vpop.eup %2594 }
 0x329   :  { %1344 = vrot.lane.b32.xlu0 %v2595_v11, %s2887_s8  ;;  %v1751_v11 = vunpack.c.l.s8.bf16 %v1567_v2 }
 0x39b   :  { %v1345_v12 = vpop.permute.xlu0 %1344 }
 0x39c   :  { %v1347_v13 = vmul.f32 %v1345_v12, %v1339_v55  ;;  %v1879_v55 = vunpack.c.l.s8.bf16 %v1631_v3  ;;  %v1559_v12 = vld [vmem:[#allocation17 + $0x188] sm:$0xff] }
 0x39d   :  { %v1735_v22 = vunpack.c.l.s8.bf16 %v1559_v12 }
 0x39e   :  { %v1348_v16 = vadd.f32 %v1347_v13, %v1334_v61  ;;  %v1774_v61 = vunpack.c.h.s8.bf16 %v1574_v60  ;;  %v1623_v13 = vld [vmem:[#allocation17 + $0x388] sm:$0xff] }
 0x39f   :  { %v1863_v23 = vunpack.c.l.s8.bf16 %v1623_v13 }
 0x3a0   :  { %v1349_v19 = vpack.c.bf16 %v1348_v16, %v1348_v16  ;;  %v1743_v16 = vunpack.c.h.s8.bf16 %v1559_v12 }
 0x3a2   :  { %2480 = vmatmul.mubr.msk.bf16.vlgmr.msra.gmra.mxu0 %vm1420_vm0, %v1349_v19  ;;  %2481 = vmatmul.mubr.msk.bf16.vlgmr.msra.gmra.mxu1 %vm1420_vm0, %v1349_v19  ;;  %v1622_v19 = vld [vmem:[#allocation17 + $0x380] sm:$0xff] }
 0x3a3   :  { %1899 = vmatpush1.bf16.msra.mxu0 %v1694_v17  ;;  %1940 = vmatpush1.bf16.msra.mxu1 %v1822_v18  ;;  %v1871_v17 = vunpack.c.h.s8.bf16 %v1623_v13  ;;  %v1558_v18 = vld [vmem:[#allocation17 + $0x180] sm:$0xff]  ;;  %v1536_v13 = vld [vmem:[#allocation17 + $0xd0] sm:$0xff] }
 0x3a4   :  { %1900 = vmatprep.subr.bf16.mxu0 %v1687_v20  ;;  %1941 = vmatprep.subr.bf16.mxu1 %v1815_v21  ;;  %v1742_v20 = vunpack.c.h.s8.bf16 %v1558_v18  ;;  %v1870_v21 = vunpack.c.h.s8.bf16 %v1622_v19 }
 0x3a7   :  { %1901 = vmatpush1.bf16.msra.mxu0 %v1686_v24  ;;  %1942 = vmatpush1.bf16.msra.mxu1 %v1814_v25  ;;  %v1551_v24 = vld [vmem:[#allocation17 + $0x148] sm:$0xff] }
 0x3a8   :  { %1902 = vmatprep.subr.bf16.mxu0 %v1679_v27  ;;  %1943 = vmatprep.subr.bf16.mxu1 %v1807_v28  ;;  %v1615_v25 = vld [vmem:[#allocation17 + $0x348] sm:$0xff]  ;;  %v1734_v27 = vunpack.c.l.s8.bf16 %v1558_v18  ;;  %v1862_v28 = vunpack.c.l.s8.bf16 %v1622_v19  ;;  %v1727_v29 = vunpack.c.h.s8.bf16 %v1551_v24  ;;  %v1719_v40 = vunpack.c.l.s8.bf16 %v1551_v24 }
 0x3a9   :  { %v1855_v32 = vunpack.c.h.s8.bf16 %v1615_v25  ;;  %v1847_v42 = vunpack.c.l.s8.bf16 %v1615_v25 }
 0x3ab   :  { %1903 = vmatpush1.bf16.msra.mxu0 %v1678_v34  ;;  %1944 = vmatpush1.bf16.msra.mxu1 %v1806_v36  ;;  %v1550_v34 = vld [vmem:[#allocation17 + $0x140] sm:$0xff] }
 0x3ac   :  { %1904 = vmatprep.subr.bf16.mxu0 %v1671_v37  ;;  %1945 = vmatprep.subr.bf16.mxu1 %v1799_v39  ;;  %v1614_v36 = vld [vmem:[#allocation17 + $0x340] sm:$0xff]  ;;  %v1726_v37 = vunpack.c.h.s8.bf16 %v1550_v34 }
 0x3ad   :  { %v1854_v39 = vunpack.c.h.s8.bf16 %v1614_v36 }
 0x3af   :  { %1905 = vmatpush1.bf16.msra.mxu0 %v1670_v43  ;;  %1946 = vmatpush1.bf16.msra.mxu1 %v1798_v0  ;;  %v1718_v43 = vunpack.c.l.s8.bf16 %v1550_v34  ;;  %v1846_v0 = vunpack.c.l.s8.bf16 %v1614_v36 }
 0x3b0   :  { %1906 = vmatprep.subr.bf16.mxu0 %v1663_v1  ;;  %1947 = vmatprep.subr.bf16.mxu1 %v1791_v44  ;;  %v1543_v1 = vld [vmem:[#allocation17 + $0x108] sm:$0xff] }
 0x3b1   :  { %v1607_v44 = vld [vmem:[#allocation17 + $0x308] sm:$0xff]  ;;  %v1711_v45 = vunpack.c.h.s8.bf16 %v1543_v1  ;;  %v1703_v8 = vunpack.c.l.s8.bf16 %v1543_v1 }
 0x3b2   :  { %v1839_v31 = vunpack.c.h.s8.bf16 %v1607_v44  ;;  %v1831_v57 = vunpack.c.l.s8.bf16 %v1607_v44  ;;  %v1521_v44 = vld [vmem:[#allocation17 + $0x58] sm:$0xff] }
 0x3b3   :  { %1907 = vmatpush1.bf16.msra.mxu0 %v1662_v47  ;;  %1948 = vmatpush1.bf16.msra.mxu1 %v1790_v50  ;;  %v1542_v47 = vld [vmem:[#allocation17 + $0x100] sm:$0xff] }
 0x3b4   :  { %1908 = vmatprep.subr.bf16.mxu0 %v1655_v51  ;;  %1949 = vmatprep.subr.bf16.mxu1 %v1783_v56  ;;  %v1606_v50 = vld [vmem:[#allocation17 + $0x300] sm:$0xff]  ;;  %v1710_v51 = vunpack.c.h.s8.bf16 %v1542_v47 }
 0x3b5   :  { %v1838_v56 = vunpack.c.h.s8.bf16 %v1606_v50 }
 0x3b7   :  { %1909 = vmatpush1.bf16.msra.mxu0 %v1654_v38  ;;  %1950 = vmatpush1.bf16.msra.mxu1 %v1782_v9  ;;  %v1702_v38 = vunpack.c.l.s8.bf16 %v1542_v47  ;;  %v1830_v9 = vunpack.c.l.s8.bf16 %v1606_v50  ;;  %v1665_v50 = vunpack.c.h.s8.bf16 %v1521_v44 }
 0x3b8   :  { %1910 = vmatprep.subr.bf16.mxu0 %v1647_v58  ;;  %1951 = vmatprep.subr.bf16.mxu1 %v1775_v59  ;;  %v1537_v58 = vld [vmem:[#allocation17 + $0xd8] sm:$0xff] }
 0x3b9   :  { %v1601_v59 = vld [vmem:[#allocation17 + $0x2d8] sm:$0xff]  ;;  %v1697_v52 = vunpack.c.h.s8.bf16 %v1537_v58  ;;  %v1689_v25 = vunpack.c.l.s8.bf16 %v1537_v58 }
 0x3ba   :  { %v1825_v60 = vunpack.c.h.s8.bf16 %v1601_v59 }
 0x3bb   :  { %1911 = vmatpush1.bf16.msra.mxu0 %v1646_v54  ;;  %1952 = vmatpush1.bf16.msra.mxu1 %v1774_v61  ;;  %v1358_v54 = vld [vmem:[#allocation16] sm:$0xf] }
 0x3bc   :  { %1912 = vmatprep.subr.bf16.mxu0 %v1639_v62  ;;  %1953 = vmatprep.subr.bf16.mxu1 %v1767_v63  ;;  %v1363_v61 = vrot.slane %v1358_v54, %v3059_v30  ;;  %v1371_v62 = vrot.slane %v1358_v54, %v3077_v15  ;;  %v1367_v63 = vrot.slane %v1358_v54, %v3064_v33 }
 0x3bd   :  { %v1375_v2 = vrot.slane %v1358_v54, %v3080_v48 }
 0x3bf   :  { %1913 = vmatpush1.bf16.msra.mxu0 %v1638_v4  ;;  %1954 = vmatpush1.bf16.msra.mxu1 %v1766_v5 }
 0x3c0   :  { %1914 = vmatprep.subr.bf16.mxu0 %v1759_v6  ;;  %1955 = vmatprep.subr.bf16.mxu1 %v1887_v7 }
 0x3c3   :  { %1915 = vmatpush2.bf16.msra.mxu0 %v1758_v10  ;;  %1956 = vmatpush2.bf16.msra.mxu1 %v1886_v53 }
 0x3c4   :  { %1916 = vmatprep.subr.bf16.mxu0 %v1751_v11  ;;  %1957 = vmatprep.subr.bf16.mxu1 %v1879_v55 }
 0x3c7   :  { %1917 = vmatpush2.bf16.msra.mxu0 %v1750_v14  ;;  %1958 = vmatpush2.bf16.msra.mxu1 %v1878_v49  ;;  %v1600_v14 = vld [vmem:[#allocation17 + $0x2d0] sm:$0xff] }
 0x3c8   :  { %1918 = vmatprep.subr.bf16.mxu0 %v1743_v16  ;;  %1959 = vmatprep.subr.bf16.mxu1 %v1871_v17  ;;  %v1816_v34 = vunpack.c.l.s8.bf16 %v1600_v14 }
 0x3cb   :  { %1919 = vmatpush2.bf16.msra.mxu0 %v1742_v20  ;;  %1960 = vmatpush2.bf16.msra.mxu1 %v1870_v21  ;;  %v1696_v21 = vunpack.c.h.s8.bf16 %v1536_v13 }
 0x3cc   :  { %1920 = vmatprep.subr.bf16.mxu0 %v1735_v22  ;;  %1961 = vmatprep.subr.bf16.mxu1 %v1863_v23  ;;  %v1824_v22 = vunpack.c.h.s8.bf16 %v1600_v14 }
 0x3cf   :  { %1921 = vmatpush2.bf16.msra.mxu0 %v1734_v27  ;;  %1962 = vmatpush2.bf16.msra.mxu1 %v1862_v28  ;;  %v1817_v27 = vunpack.c.l.s8.bf16 %v1601_v59  ;;  %v1529_v28 = vld [vmem:[#allocation17 + $0x98] sm:$0xff] }
 0x3d0   :  { %1922 = vmatprep.subr.bf16.mxu0 %v1727_v29  ;;  %1963 = vmatprep.subr.bf16.mxu1 %v1855_v32  ;;  %v1593_v29 = vld [vmem:[#allocation17 + $0x298] sm:$0xff]  ;;  %v1688_v32 = vunpack.c.l.s8.bf16 %v1536_v13  ;;  %v1681_v36 = vunpack.c.h.s8.bf16 %v1529_v28 }
 0x3d1   :  { %v1801_v1 = vunpack.c.l.s8.bf16 %v1593_v29  ;;  %v1513_v59 = vld [vmem:[#allocation17 + $0x18] sm:$0xff] }
 0x3d3   :  { %1923 = vmatpush2.bf16.msra.mxu0 %v1726_v37  ;;  %1964 = vmatpush2.bf16.msra.mxu1 %v1854_v39  ;;  %v1809_v37 = vunpack.c.h.s8.bf16 %v1593_v29  ;;  %v1528_v39 = vld [vmem:[#allocation17 + $0x90] sm:$0xff] }
 0x3d4   :  { %1924 = vmatprep.subr.bf16.mxu0 %v1719_v40  ;;  %1965 = vmatprep.subr.bf16.mxu1 %v1847_v42  ;;  %v1592_v40 = vld [vmem:[#allocation17 + $0x290] sm:$0xff]  ;;  %v1680_v42 = vunpack.c.h.s8.bf16 %v1528_v39 }
 0x3d5   :  { %v1800_v47 = vunpack.c.l.s8.bf16 %v1592_v40  ;;  %v1624_v29 = vld [vmem:[#allocation17 + $0x390] sm:$0xff] }
 0x3d7   :  { %1925 = vmatpush2.bf16.msra.mxu0 %v1718_v43  ;;  %1966 = vmatpush2.bf16.msra.mxu1 %v1846_v0  ;;  %v1808_v43 = vunpack.c.h.s8.bf16 %v1592_v40  ;;  %v1673_v0 = vunpack.c.l.s8.bf16 %v1529_v28  ;;  %v1560_v28 = vld [vmem:[#allocation17 + $0x190] sm:$0xff]  ;;  %v1617_v40 = vld [vmem:[#allocation17 + $0x358] sm:$0xff] }
 0x3d8   :  { %1926 = vmatprep.subr.bf16.mxu0 %v1711_v45  ;;  %1967 = vmatprep.subr.bf16.mxu1 %v1839_v31  ;;  %v1585_v45 = vld [vmem:[#allocation17 + $0x258] sm:$0xff]  ;;  %v1672_v31 = vunpack.c.l.s8.bf16 %v1528_v39 }
 0x3d9   :  { %v1785_v58 = vunpack.c.l.s8.bf16 %v1585_v45  ;;  %v1553_v39 = vld [vmem:[#allocation17 + $0x158] sm:$0xff] }
 0x3db   :  { %1927 = vmatpush2.bf16.msra.mxu0 %v1710_v51  ;;  %1968 = vmatpush2.bf16.msra.mxu1 %v1838_v56  ;;  %v1793_v51 = vunpack.c.h.s8.bf16 %v1585_v45  ;;  %v1520_v56 = vld [vmem:[#allocation17 + $0x50] sm:$0xff] }
 0x3dc   :  { %1928 = vmatprep.subr.bf16.mxu0 %v1703_v8  ;;  %1969 = vmatprep.subr.bf16.mxu1 %v1831_v57  ;;  %v1584_v8 = vld [vmem:[#allocation17 + $0x250] sm:$0xff]  ;;  %v1664_v57 = vunpack.c.h.s8.bf16 %v1520_v56 }
 0x3dd   :  { %v1784_v54 = vunpack.c.l.s8.bf16 %v1584_v8  ;;  %v1616_v45 = vld [vmem:[#allocation17 + $0x350] sm:$0xff] }
 0x3df   :  { %1929 = vmatpush2.bf16.msra.mxu0 %v1702_v38  ;;  %1970 = vmatpush2.bf16.msra.mxu1 %v1830_v9  ;;  %v1792_v38 = vunpack.c.h.s8.bf16 %v1584_v8  ;;  %v1657_v9 = vunpack.c.l.s8.bf16 %v1521_v44  ;;  %v1552_v44 = vld [vmem:[#allocation17 + $0x150] sm:$0xff]  ;;  %v1609_v8 = vld [vmem:[#allocation17 + $0x318] sm:$0xff] }
 0x3e0   :  { %1980 = vmatprep.subr.bf16.mxu0 %v1697_v52  ;;  %2021 = vmatprep.subr.bf16.mxu1 %v1825_v60  ;;  %v1577_v52 = vld [vmem:[#allocation17 + $0x218] sm:$0xff]  ;;  %v1656_v60 = vunpack.c.l.s8.bf16 %v1520_v56 }
 0x3e1   :  { %v1545_v56 = vld [vmem:[#allocation17 + $0x118] sm:$0xff] }
 0x462   :  { %v1458_v3 = vpop.f32.mrf.mxu0  ;;  %v1499_v4 = vpop.f32.mrf.mxu1 }
 0x463   :  { %v1459_v5 = vadd.f32 %v1458_v3, %v1363_v61  ;;  %v1500_v6 = vadd.f32 %v1499_v4, %v1371_v62  ;;  %v1649_v61 = vunpack.c.h.s8.bf16 %v1513_v59  ;;  %v1777_v62 = vunpack.c.h.s8.bf16 %v1577_v52 }
 0x464   :  { %v1460_v7 = vpop.f32.mrf.mxu0  ;;  %v1501_v41 = vpop.f32.mrf.mxu1 }
 0x465   :  { %v1461_v46 = vadd.f32 %v1460_v7, %v1367_v63  ;;  %v1502_v10 = vadd.f32 %v1501_v41, %v1375_v2  ;;  %v1506_v53 = vmax.f32 %v1459_v5, 0.0  ;;  %v1508_v11 = vmax.f32 %v1500_v6, 0.0  ;;  %v1512_v63 = vld [vmem:[#allocation17 + $0x10] sm:$0xff]  ;;  %v1569_v7 = vld [vmem:[#allocation17 + $0x1d8] sm:$0xff] }
 0x466   :  { %v1462_v55 = vpop.f32.mrf.mxu0  ;;  %v1503_v12 = vpop.f32.mrf.mxu1  ;;  %v1576_v2 = vld [vmem:[#allocation17 + $0x210] sm:$0xff]  ;;  %v1648_v3 = vunpack.c.h.s8.bf16 %v1512_v63  ;;  %v1641_v5 = vunpack.c.l.s8.bf16 %v1513_v59  ;;  %v1769_v6 = vunpack.c.l.s8.bf16 %v1577_v52  ;;  %v1633_v41 = vld [vmem:[#allocation17 + $0x3d8] sm:$0xff] }
 0x467   :  { %v1507_v49 = vmax.f32 %v1461_v46, 0.0  ;;  %v1509_v16 = vmax.f32 %v1502_v10, 0.0  ;;  %v3098_v23 = vpack.c.bf16 %v1506_v53, %v1506_v53  ;;  %v3100_v24 = vpack.c.bf16 %v1508_v11, %v1508_v11  ;;  %v1568_v55 = vld [vmem:[#allocation17 + $0x1d0] sm:$0xff] }
 0x468   :  { %v1463_v17 = vpop.f32.mrf.mxu0  ;;  %v1504_v18 = vpop.f32.mrf.mxu1  ;;  %v1776_v4 = vunpack.c.h.s8.bf16 %v1576_v2  ;;  %v1640_v46 = vunpack.c.l.s8.bf16 %v1512_v63  ;;  %v1768_v10 = vunpack.c.l.s8.bf16 %v1576_v2  ;;  %v1761_v53 = vunpack.c.h.s8.bf16 %v1569_v7  ;;  %v1632_v12 = vld [vmem:[#allocation17 + $0x3d0] sm:$0xff]  ;;  %v1539_v63 = vld [vmem:[#allocation17 + $0xe8] sm:$0xff] }
 0x469   :  { %v3094_v19 = vpack.c.bf16 %v1507_v49, %v1507_v49  ;;  %v3096_v20 = vpack.c.bf16 %v1509_v16, %v1509_v16  ;;  %v1889_v11 = vunpack.c.h.s8.bf16 %v1633_v41  ;;  %v1760_v13 = vunpack.c.h.s8.bf16 %v1568_v55  ;;  %v1561_v17 = vld [vmem:[#allocation17 + $0x198] sm:$0xff]  ;;  %v1544_v59 = vld [vmem:[#allocation17 + $0x110] sm:$0xff]  ;;  %v1603_v2 = vld [vmem:[#allocation17 + $0x2e8] sm:$0xff] }
 0x46a   :  { %v1888_v14 = vunpack.c.h.s8.bf16 %v1632_v12  ;;  %v1753_v49 = vunpack.c.l.s8.bf16 %v1569_v7  ;;  %v1881_v16 = vunpack.c.l.s8.bf16 %v1633_v41  ;;  %v1625_v18 = vld [vmem:[#allocation17 + $0x398] sm:$0xff]  ;;  %v1608_v52 = vld [vmem:[#allocation17 + $0x310] sm:$0xff]  ;;  %v1538_v7 = vld [vmem:[#allocation17 + $0xe0] sm:$0xff] }
 0x46b   :  { %1930 = vmatprep.mubr.bf16.mxu0 %v3094_v19  ;;  %1971 = vmatprep.mubr.bf16.mxu1 %v3096_v20  ;;  %v1602_v41 = vld [vmem:[#allocation17 + $0x2e0] sm:$0xff] }
 0x46c   :  { %1931 = vmatmul.mubr.bf16.vlgmr.msra.gmra.mxu0 %v3098_v23  ;;  %1972 = vmatmul.mubr.bf16.vlgmr.msra.gmra.mxu1 %v3100_v24 }
 0x46d   :  { %1981 = vmatpush1.bf16.msra.mxu0 %v1696_v21  ;;  %2022 = vmatpush1.bf16.msra.mxu1 %v1824_v22  ;;  %v1752_v21 = vunpack.c.l.s8.bf16 %v1568_v55  ;;  %v1880_v22 = vunpack.c.l.s8.bf16 %v1632_v12  ;;  %v1531_v55 = vld [vmem:[#allocation17 + $0xa8] sm:$0xff] }
 0x46e   :  { %2012 = vmatprep.mubr.bf16.mxu0 %v3094_v19  ;;  %2053 = vmatprep.mubr.bf16.mxu1 %v3096_v20  ;;  %v1595_v12 = vld [vmem:[#allocation17 + $0x2a8] sm:$0xff] }
 0x46f   :  { %1982 = vmatprep.subr.bf16.mxu0 %v1689_v25  ;;  %2023 = vmatprep.subr.bf16.mxu1 %v1817_v27  ;;  %v1745_v25 = vunpack.c.h.s8.bf16 %v1561_v17  ;;  %v1873_v27 = vunpack.c.h.s8.bf16 %v1625_v18 }
 0x471   :  { %1983 = vmatpush1.bf16.msra.mxu0 %v1688_v32  ;;  %2024 = vmatpush1.bf16.msra.mxu1 %v1816_v34  ;;  %v1744_v32 = vunpack.c.h.s8.bf16 %v1560_v28  ;;  %v1872_v34 = vunpack.c.h.s8.bf16 %v1624_v29 }
 0x472   :  { %1984 = vmatprep.subr.bf16.mxu0 %v1681_v36  ;;  %2025 = vmatprep.subr.bf16.mxu1 %v1809_v37  ;;  %v1737_v36 = vunpack.c.l.s8.bf16 %v1561_v17  ;;  %v1865_v37 = vunpack.c.l.s8.bf16 %v1625_v18  ;;  %v1811_v17 = vunpack.c.h.s8.bf16 %v1595_v12  ;;  %v1594_v18 = vld [vmem:[#allocation17 + $0x2a0] sm:$0xff] }
 0x475   :  { %1985 = vmatpush1.bf16.msra.mxu0 %v1680_v42  ;;  %2026 = vmatpush1.bf16.msra.mxu1 %v1808_v43  ;;  %v1736_v42 = vunpack.c.l.s8.bf16 %v1560_v28  ;;  %v1864_v43 = vunpack.c.l.s8.bf16 %v1624_v29  ;;  %v1523_v28 = vld [vmem:[#allocation17 + $0x68] sm:$0xff] }
 0x476   :  { %1986 = vmatprep.subr.bf16.mxu0 %v1673_v0  ;;  %2027 = vmatprep.subr.bf16.mxu1 %v1801_v1  ;;  %v1729_v0 = vunpack.c.h.s8.bf16 %v1553_v39  ;;  %v1857_v1 = vunpack.c.h.s8.bf16 %v1617_v40  ;;  %v1587_v29 = vld [vmem:[#allocation17 + $0x268] sm:$0xff] }
 0x479   :  { %1987 = vmatpush1.bf16.msra.mxu0 %v1672_v31  ;;  %2028 = vmatpush1.bf16.msra.mxu1 %v1800_v47  ;;  %v1728_v31 = vunpack.c.h.s8.bf16 %v1552_v44  ;;  %v1856_v47 = vunpack.c.h.s8.bf16 %v1616_v45 }
 0x47a   :  { %1988 = vmatprep.subr.bf16.mxu0 %v1665_v50  ;;  %2029 = vmatprep.subr.bf16.mxu1 %v1793_v51  ;;  %v1721_v50 = vunpack.c.l.s8.bf16 %v1553_v39  ;;  %v1849_v51 = vunpack.c.l.s8.bf16 %v1617_v40  ;;  %v1795_v39 = vunpack.c.h.s8.bf16 %v1587_v29  ;;  %v1586_v40 = vld [vmem:[#allocation17 + $0x260] sm:$0xff] }
 0x47d   :  { %1989 = vmatpush1.bf16.msra.mxu0 %v1664_v57  ;;  %2030 = vmatpush1.bf16.msra.mxu1 %v1792_v38  ;;  %v1720_v57 = vunpack.c.l.s8.bf16 %v1552_v44  ;;  %v1848_v38 = vunpack.c.l.s8.bf16 %v1616_v45  ;;  %v1515_v44 = vld [vmem:[#allocation17 + $0x28] sm:$0xff] }
 0x47e   :  { %1990 = vmatprep.subr.bf16.mxu0 %v1657_v9  ;;  %2031 = vmatprep.subr.bf16.mxu1 %v1785_v58  ;;  %v1713_v9 = vunpack.c.h.s8.bf16 %v1545_v56  ;;  %v1841_v58 = vunpack.c.h.s8.bf16 %v1609_v8  ;;  %v1579_v45 = vld [vmem:[#allocation17 + $0x228] sm:$0xff] }
 0x481   :  { %1991 = vmatpush1.bf16.msra.mxu0 %v1656_v60  ;;  %2032 = vmatpush1.bf16.msra.mxu1 %v1784_v54  ;;  %v1712_v60 = vunpack.c.h.s8.bf16 %v1544_v59  ;;  %v1840_v54 = vunpack.c.h.s8.bf16 %v1608_v52 }
 0x482   :  { %1992 = vmatprep.subr.bf16.mxu0 %v1649_v61  ;;  %2033 = vmatprep.subr.bf16.mxu1 %v1777_v62  ;;  %v1705_v61 = vunpack.c.l.s8.bf16 %v1545_v56  ;;  %v1833_v62 = vunpack.c.l.s8.bf16 %v1609_v8  ;;  %v1779_v56 = vunpack.c.h.s8.bf16 %v1579_v45  ;;  %v1578_v8 = vld [vmem:[#allocation17 + $0x220] sm:$0xff] }
 0x485   :  { %1993 = vmatpush1.bf16.msra.mxu0 %v1648_v3  ;;  %2034 = vmatpush1.bf16.msra.mxu1 %v1776_v4  ;;  %v1704_v3 = vunpack.c.l.s8.bf16 %v1544_v59  ;;  %v1832_v4 = vunpack.c.l.s8.bf16 %v1608_v52  ;;  %v1571_v59 = vld [vmem:[#allocation17 + $0x1e8] sm:$0xff] }
 0x486   :  { %1994 = vmatprep.subr.bf16.mxu0 %v1641_v5  ;;  %2035 = vmatprep.subr.bf16.mxu1 %v1769_v6  ;;  %v1699_v5 = vunpack.c.h.s8.bf16 %v1539_v63  ;;  %v1827_v6 = vunpack.c.h.s8.bf16 %v1603_v2  ;;  %v1635_v52 = vld [vmem:[#allocation17 + $0x3e8] sm:$0xff] }
 0x489   :  { %1995 = vmatpush1.bf16.msra.mxu0 %v1640_v46  ;;  %2036 = vmatpush1.bf16.msra.mxu1 %v1768_v10  ;;  %v1698_v46 = vunpack.c.h.s8.bf16 %v1538_v7  ;;  %v1826_v10 = vunpack.c.h.s8.bf16 %v1602_v41 }
 0x48a   :  { %1996 = vmatprep.subr.bf16.mxu0 %v1761_v53  ;;  %2037 = vmatprep.subr.bf16.mxu1 %v1889_v11  ;;  %v1691_v53 = vunpack.c.l.s8.bf16 %v1539_v63  ;;  %v1819_v11 = vunpack.c.l.s8.bf16 %v1603_v2  ;;  %v1891_v63 = vunpack.c.h.s8.bf16 %v1635_v52  ;;  %v1634_v2 = vld [vmem:[#allocation17 + $0x3e0] sm:$0xff] }
 0x48d   :  { %1997 = vmatpush2.bf16.msra.mxu0 %v1760_v13  ;;  %2038 = vmatpush2.bf16.msra.mxu1 %v1888_v14  ;;  %v1690_v13 = vunpack.c.l.s8.bf16 %v1538_v7  ;;  %v1818_v14 = vunpack.c.l.s8.bf16 %v1602_v41  ;;  %v1563_v7 = vld [vmem:[#allocation17 + $0x1a8] sm:$0xff] }
 0x48e   :  { %1998 = vmatprep.subr.bf16.mxu0 %v1753_v49  ;;  %2039 = vmatprep.subr.bf16.mxu1 %v1881_v16  ;;  %v1683_v49 = vunpack.c.h.s8.bf16 %v1531_v55  ;;  %v1530_v16 = vld [vmem:[#allocation17 + $0xa0] sm:$0xff]  ;;  %v1627_v41 = vld [vmem:[#allocation17 + $0x3a8] sm:$0xff] }
 0x491   :  { %1999 = vmatpush2.bf16.msra.mxu0 %v1752_v21  ;;  %2040 = vmatpush2.bf16.msra.mxu1 %v1880_v22  ;;  %v1682_v21 = vunpack.c.h.s8.bf16 %v1530_v16  ;;  %v1810_v22 = vunpack.c.h.s8.bf16 %v1594_v18 }
 0x492   :  { %2000 = vmatprep.subr.bf16.mxu0 %v1745_v25  ;;  %2041 = vmatprep.subr.bf16.mxu1 %v1873_v27  ;;  %v1675_v25 = vunpack.c.l.s8.bf16 %v1531_v55  ;;  %v1803_v27 = vunpack.c.l.s8.bf16 %v1595_v12  ;;  %v1875_v55 = vunpack.c.h.s8.bf16 %v1627_v41  ;;  %v1626_v12 = vld [vmem:[#allocation17 + $0x3a0] sm:$0xff] }
 0x495   :  { %2001 = vmatpush2.bf16.msra.mxu0 %v1744_v32  ;;  %2042 = vmatpush2.bf16.msra.mxu1 %v1872_v34  ;;  %v1674_v32 = vunpack.c.l.s8.bf16 %v1530_v16  ;;  %v1802_v34 = vunpack.c.l.s8.bf16 %v1594_v18  ;;  %v1867_v16 = vunpack.c.l.s8.bf16 %v1627_v41  ;;  %v1619_v18 = vld [vmem:[#allocation17 + $0x368] sm:$0xff]  ;;  %v1596_v41 = vld [vmem:[#allocation17 + $0x2b0] sm:$0xff] }
 0x496   :  { %2002 = vmatprep.subr.bf16.mxu0 %v1737_v36  ;;  %2043 = vmatprep.subr.bf16.mxu1 %v1865_v37  ;;  %v1667_v36 = vunpack.c.h.s8.bf16 %v1523_v28  ;;  %v1522_v37 = vld [vmem:[#allocation17 + $0x60] sm:$0xff] }
 0x499   :  { %2003 = vmatpush2.bf16.msra.mxu0 %v1736_v42  ;;  %2044 = vmatpush2.bf16.msra.mxu1 %v1864_v43  ;;  %v1666_v42 = vunpack.c.h.s8.bf16 %v1522_v37  ;;  %v1794_v43 = vunpack.c.h.s8.bf16 %v1586_v40 }
 0x49a   :  { %2004 = vmatprep.subr.bf16.mxu0 %v1729_v0  ;;  %2045 = vmatprep.subr.bf16.mxu1 %v1857_v1  ;;  %v1659_v0 = vunpack.c.l.s8.bf16 %v1523_v28  ;;  %v1787_v1 = vunpack.c.l.s8.bf16 %v1587_v29  ;;  %v1859_v28 = vunpack.c.h.s8.bf16 %v1619_v18  ;;  %v1618_v29 = vld [vmem:[#allocation17 + $0x360] sm:$0xff] }
 0x49d   :  { %2005 = vmatpush2.bf16.msra.mxu0 %v1728_v31  ;;  %2046 = vmatpush2.bf16.msra.mxu1 %v1856_v47  ;;  %v1658_v31 = vunpack.c.l.s8.bf16 %v1522_v37  ;;  %v1786_v47 = vunpack.c.l.s8.bf16 %v1586_v40  ;;  %v1851_v37 = vunpack.c.l.s8.bf16 %v1619_v18  ;;  %v1611_v40 = vld [vmem:[#allocation17 + $0x328] sm:$0xff] }
 0x49e   :  { %2006 = vmatprep.subr.bf16.mxu0 %v1721_v50  ;;  %2047 = vmatprep.subr.bf16.mxu1 %v1849_v51  ;;  %v1651_v50 = vunpack.c.h.s8.bf16 %v1515_v44  ;;  %v1514_v51 = vld [vmem:[#allocation17 + $0x20] sm:$0xff] }
 0x4a1   :  { %2007 = vmatpush2.bf16.msra.mxu0 %v1720_v57  ;;  %2048 = vmatpush2.bf16.msra.mxu1 %v1848_v38  ;;  %v1650_v57 = vunpack.c.h.s8.bf16 %v1514_v51  ;;  %v1778_v38 = vunpack.c.h.s8.bf16 %v1578_v8 }
 0x4a2   :  { %2008 = vmatprep.subr.bf16.mxu0 %v1713_v9  ;;  %2049 = vmatprep.subr.bf16.mxu1 %v1841_v58  ;;  %v1643_v9 = vunpack.c.l.s8.bf16 %v1515_v44  ;;  %v1771_v58 = vunpack.c.l.s8.bf16 %v1579_v45  ;;  %v1843_v44 = vunpack.c.h.s8.bf16 %v1611_v40  ;;  %v1610_v45 = vld [vmem:[#allocation17 + $0x320] sm:$0xff] }
 0x4a5   :  { %2009 = vmatpush2.bf16.msra.mxu0 %v1712_v60  ;;  %2050 = vmatpush2.bf16.msra.mxu1 %v1840_v54  ;;  %v1642_v60 = vunpack.c.l.s8.bf16 %v1514_v51  ;;  %v1770_v54 = vunpack.c.l.s8.bf16 %v1578_v8  ;;  %v1835_v51 = vunpack.c.l.s8.bf16 %v1611_v40  ;;  %v1605_v8 = vld [vmem:[#allocation17 + $0x2f8] sm:$0xff] }
 0x4a6   :  { %2010 = vmatprep.subr.bf16.mxu0 %v1705_v61  ;;  %2051 = vmatprep.subr.bf16.mxu1 %v1833_v62  ;;  %v1763_v61 = vunpack.c.h.s8.bf16 %v1571_v59  ;;  %v1570_v62 = vld [vmem:[#allocation17 + $0x1e0] sm:$0xff] }
 0x4a9   :  { %2011 = vmatpush2.bf16.msra.mxu0 %v1704_v3  ;;  %2052 = vmatpush2.bf16.msra.mxu1 %v1832_v4  ;;  %v1762_v3 = vunpack.c.h.s8.bf16 %v1570_v62  ;;  %v1890_v4 = vunpack.c.h.s8.bf16 %v1634_v2 }
 0x4aa   :  { %2062 = vmatprep.subr.bf16.mxu0 %v1699_v5  ;;  %2103 = vmatprep.subr.bf16.mxu1 %v1827_v6  ;;  %v1755_v5 = vunpack.c.l.s8.bf16 %v1571_v59  ;;  %v1883_v6 = vunpack.c.l.s8.bf16 %v1635_v52  ;;  %v1829_v59 = vunpack.c.h.s8.bf16 %v1605_v8  ;;  %v1604_v52 = vld [vmem:[#allocation17 + $0x2f0] sm:$0xff] }
 0x4ac   :  { %2013 = vmatmul.mubr.bf16.vlgmr.msra.gmra.mxu0 %v3098_v23  ;;  %2054 = vmatmul.mubr.bf16.vlgmr.msra.gmra.mxu1 %v3100_v24 }
 0x4ad   :  { %2063 = vmatpush1.bf16.msra.mxu0 %v1698_v46  ;;  %2094 = vmatprep.mubr.bf16.mxu0 %v3094_v19  ;;  %v1754_v46 = vunpack.c.l.s8.bf16 %v1570_v62  ;;  %v1533_v62 = vld [vmem:[#allocation17 + $0xb8] sm:$0xff] }
 0x4ae   :  { %2104 = vmatpush1.bf16.msra.mxu1 %v1826_v10  ;;  %2135 = vmatprep.mubr.bf16.mxu1 %v3096_v20  ;;  %v1882_v10 = vunpack.c.l.s8.bf16 %v1634_v2  ;;  %v1597_v2 = vld [vmem:[#allocation17 + $0x2b8] sm:$0xff] }
 0x4af   :  { %2064 = vmatprep.subr.bf16.mxu0 %v1691_v53  ;;  %2105 = vmatprep.subr.bf16.mxu1 %v1819_v11  ;;  %v1747_v53 = vunpack.c.h.s8.bf16 %v1563_v7  ;;  %v1562_v11 = vld [vmem:[#allocation17 + $0x1a0] sm:$0xff] }
 0x4b1   :  { %2065 = vmatpush1.bf16.msra.mxu0 %v1690_v13  ;;  %v1746_v13 = vunpack.c.h.s8.bf16 %v1562_v11 }
 0x4b2   :  { %2106 = vmatpush1.bf16.msra.mxu1 %v1818_v14  ;;  %2066 = vmatprep.subr.bf16.mxu0 %v1683_v49  ;;  %v1874_v14 = vunpack.c.h.s8.bf16 %v1626_v12  ;;  %v1739_v49 = vunpack.c.l.s8.bf16 %v1563_v7  ;;  %v1813_v7 = vunpack.c.h.s8.bf16 %v1597_v2 }
 0x4b3   :  { %2107 = vmatprep.subr.bf16.mxu1 %v1811_v17  ;;  %v1555_v17 = vld [vmem:[#allocation17 + $0x168] sm:$0xff] }
 0x4b5   :  { %2067 = vmatpush1.bf16.msra.mxu0 %v1682_v21  ;;  %v1738_v21 = vunpack.c.l.s8.bf16 %v1562_v11  ;;  %v1805_v11 = vunpack.c.l.s8.bf16 %v1597_v2 }
 0x4b6   :  { %2108 = vmatpush1.bf16.msra.mxu1 %v1810_v22  ;;  %2068 = vmatprep.subr.bf16.mxu0 %v1675_v25  ;;  %v1866_v22 = vunpack.c.l.s8.bf16 %v1626_v12  ;;  %v1731_v25 = vunpack.c.h.s8.bf16 %v1555_v17 }
 0x4b7   :  { %2109 = vmatprep.subr.bf16.mxu1 %v1803_v27  ;;  %v1554_v27 = vld [vmem:[#allocation17 + $0x160] sm:$0xff] }
 0x4b9   :  { %2069 = vmatpush1.bf16.msra.mxu0 %v1674_v32  ;;  %v1730_v32 = vunpack.c.h.s8.bf16 %v1554_v27 }
 0x4ba   :  { %2110 = vmatpush1.bf16.msra.mxu1 %v1802_v34  ;;  %2070 = vmatprep.subr.bf16.mxu0 %v1667_v36  ;;  %v1858_v34 = vunpack.c.h.s8.bf16 %v1618_v29  ;;  %v1723_v36 = vunpack.c.l.s8.bf16 %v1555_v17 }
 0x4bb   :  { %2111 = vmatprep.subr.bf16.mxu1 %v1795_v39  ;;  %v1547_v39 = vld [vmem:[#allocation17 + $0x128] sm:$0xff] }
 0x4bd   :  { %2071 = vmatpush1.bf16.msra.mxu0 %v1666_v42  ;;  %v1722_v42 = vunpack.c.l.s8.bf16 %v1554_v27  ;;  %v1581_v27 = vld [vmem:[#allocation17 + $0x238] sm:$0xff] }
 0x4be   :  { %2112 = vmatpush1.bf16.msra.mxu1 %v1794_v43  ;;  %2072 = vmatprep.subr.bf16.mxu0 %v1659_v0  ;;  %v1850_v43 = vunpack.c.l.s8.bf16 %v1618_v29  ;;  %v1715_v0 = vunpack.c.h.s8.bf16 %v1547_v39 }
 0x4bf   :  { %2113 = vmatprep.subr.bf16.mxu1 %v1787_v1  ;;  %v1546_v1 = vld [vmem:[#allocation17 + $0x120] sm:$0xff] }
 0x4c1   :  { %2073 = vmatpush1.bf16.msra.mxu0 %v1658_v31  ;;  %v1714_v31 = vunpack.c.h.s8.bf16 %v1546_v1 }
 0x4c2   :  { %2114 = vmatpush1.bf16.msra.mxu1 %v1786_v47  ;;  %2074 = vmatprep.subr.bf16.mxu0 %v1651_v50  ;;  %v1842_v47 = vunpack.c.h.s8.bf16 %v1610_v45  ;;  %v1707_v50 = vunpack.c.l.s8.bf16 %v1547_v39 }
 0x4c3   :  { %2115 = vmatprep.subr.bf16.mxu1 %v1779_v56  ;;  %v1541_v56 = vld [vmem:[#allocation17 + $0xf8] sm:$0xff] }
 0x4c5   :  { %2075 = vmatpush1.bf16.msra.mxu0 %v1650_v57  ;;  %v1706_v57 = vunpack.c.l.s8.bf16 %v1546_v1  ;;  %v1637_v1 = vld [vmem:[#allocation17 + $0x3f8] sm:$0xff] }
 0x4c6   :  { %2116 = vmatpush1.bf16.msra.mxu1 %v1778_v38  ;;  %2076 = vmatprep.subr.bf16.mxu0 %v1643_v9  ;;  %v1834_v38 = vunpack.c.l.s8.bf16 %v1610_v45  ;;  %v1701_v9 = vunpack.c.h.s8.bf16 %v1541_v56 }
 0x4c7   :  { %2117 = vmatprep.subr.bf16.mxu1 %v1771_v58  ;;  %v1540_v58 = vld [vmem:[#allocation17 + $0xf0] sm:$0xff] }
 0x4c9   :  { %2077 = vmatpush1.bf16.msra.mxu0 %v1642_v60  ;;  %v1700_v60 = vunpack.c.h.s8.bf16 %v1540_v58 }
 0x4ca   :  { %2118 = vmatpush1.bf16.msra.mxu1 %v1770_v54  ;;  %2078 = vmatprep.subr.bf16.mxu0 %v1763_v61  ;;  %v1828_v54 = vunpack.c.h.s8.bf16 %v1604_v52  ;;  %v1693_v61 = vunpack.c.l.s8.bf16 %v1541_v56 }
 0x4cb   :  { %2119 = vmatprep.subr.bf16.mxu1 %v1891_v63  ;;  %v1821_v63 = vunpack.c.l.s8.bf16 %v1605_v8 }
 0x4cd   :  { %2079 = vmatpush2.bf16.msra.mxu0 %v1762_v3  ;;  %v1692_v3 = vunpack.c.l.s8.bf16 %v1540_v58  ;;  %v1629_v58 = vld [vmem:[#allocation17 + $0x3b8] sm:$0xff] }
 0x4ce   :  { %2120 = vmatpush2.bf16.msra.mxu1 %v1890_v4  ;;  %2080 = vmatprep.subr.bf16.mxu0 %v1755_v5  ;;  %v1820_v4 = vunpack.c.l.s8.bf16 %v1604_v52  ;;  %v1685_v5 = vunpack.c.h.s8.bf16 %v1533_v62 }
 0x4cf   :  { %2121 = vmatprep.subr.bf16.mxu1 %v1883_v6  ;;  %v1532_v6 = vld [vmem:[#allocation17 + $0xb0] sm:$0xff] }
 0x4d0   :  { %v1676_v12 = vunpack.c.l.s8.bf16 %v1532_v6 }
 0x4d1   :  { %2081 = vmatpush2.bf16.msra.mxu0 %v1754_v46  ;;  %v1684_v46 = vunpack.c.h.s8.bf16 %v1532_v6  ;;  %v1621_v6 = vld [vmem:[#allocation17 + $0x378] sm:$0xff] }
 0x4d2   :  { %2122 = vmatpush2.bf16.msra.mxu1 %v1882_v10  ;;  %2082 = vmatprep.subr.bf16.mxu0 %v1747_v53  ;;  %v1812_v10 = vunpack.c.h.s8.bf16 %v1596_v41  ;;  %v1677_v53 = vunpack.c.l.s8.bf16 %v1533_v62  ;;  %v1628_v62 = vld [vmem:[#allocation17 + $0x3b0] sm:$0xff] }
 0x4d3   :  { %2123 = vmatprep.subr.bf16.mxu1 %v1875_v55  ;;  %v1525_v55 = vld [vmem:[#allocation17 + $0x78] sm:$0xff]  ;;  %v1876_v2 = vunpack.c.h.s8.bf16 %v1628_v62 }
 0x4d5   :  { %2083 = vmatpush2.bf16.msra.mxu0 %v1746_v13  ;;  %v1804_v13 = vunpack.c.l.s8.bf16 %v1596_v41  ;;  %v1868_v41 = vunpack.c.l.s8.bf16 %v1628_v62 }
 0x4d6   :  { %2124 = vmatpush2.bf16.msra.mxu1 %v1874_v14  ;;  %2084 = vmatprep.subr.bf16.mxu0 %v1739_v49  ;;  %v1524_v14 = vld [vmem:[#allocation17 + $0x70] sm:$0xff] }
 0x4d7   :  { %2125 = vmatprep.subr.bf16.mxu1 %v1867_v16  ;;  %v1588_v16 = vld [vmem:[#allocation17 + $0x270] sm:$0xff]  ;;  %v1668_v17 = vunpack.c.h.s8.bf16 %v1524_v14 }
 0x4d8   :  { %v1796_v18 = vunpack.c.h.s8.bf16 %v1588_v16  ;;  %v1788_v29 = vunpack.c.l.s8.bf16 %v1588_v16 }
 0x4d9   :  { %2085 = vmatpush2.bf16.msra.mxu0 %v1738_v21  ;;  %v1661_v21 = vunpack.c.l.s8.bf16 %v1525_v55 }
 0x4da   :  { %2126 = vmatpush2.bf16.msra.mxu1 %v1866_v22  ;;  %2086 = vmatprep.subr.bf16.mxu0 %v1731_v25  ;;  %v1517_v25 = vld [vmem:[#allocation17 + $0x38] sm:$0xff] }
 0x4db   :  { %2127 = vmatprep.subr.bf16.mxu1 %v1859_v28  ;;  %v1660_v28 = vunpack.c.l.s8.bf16 %v1524_v14  ;;  %v1613_v14 = vld [vmem:[#allocation17 + $0x338] sm:$0xff] }
 0x4dd   :  { %2087 = vmatpush2.bf16.msra.mxu0 %v1730_v32  ;;  %v1653_v32 = vunpack.c.h.s8.bf16 %v1517_v25 }
 0x4de   :  { %2128 = vmatpush2.bf16.msra.mxu1 %v1858_v34  ;;  %2088 = vmatprep.subr.bf16.mxu0 %v1723_v36  ;;  %v1516_v34 = vld [vmem:[#allocation17 + $0x30] sm:$0xff]  ;;  %v1781_v36 = vunpack.c.h.s8.bf16 %v1581_v27 }
 0x4df   :  { %2129 = vmatprep.subr.bf16.mxu1 %v1851_v37  ;;  %v1580_v37 = vld [vmem:[#allocation17 + $0x230] sm:$0xff]  ;;  %v1652_v39 = vunpack.c.h.s8.bf16 %v1516_v34 }
 0x4e0   :  { %v1780_v40 = vunpack.c.h.s8.bf16 %v1580_v37  ;;  %v1772_v45 = vunpack.c.l.s8.bf16 %v1580_v37  ;;  %v3124_v37 = vld [vmem:[%s3177_s11] sm:$0xff] }
 0x4e1   :  { %2089 = vmatpush2.bf16.msra.mxu0 %v1722_v42  ;;  %v1645_v42 = vunpack.c.l.s8.bf16 %v1517_v25 }
 0x4e2   :  { %2130 = vmatpush2.bf16.msra.mxu1 %v1850_v43  ;;  %2090 = vmatprep.subr.bf16.mxu0 %v1715_v0  ;;  %v1773_v43 = vunpack.c.l.s8.bf16 %v1581_v27  ;;  %v1573_v0 = vld [vmem:[#allocation17 + $0x1f8] sm:$0xff] }
 0x4e3   :  { %2131 = vmatprep.subr.bf16.mxu1 %v1843_v44  ;;  %v1644_v44 = vunpack.c.l.s8.bf16 %v1516_v34 }
 0x4e5   :  { %2091 = vmatpush2.bf16.msra.mxu0 %v1714_v31  ;;  %v1765_v31 = vunpack.c.h.s8.bf16 %v1573_v0 }
 0x4e6   :  { %2132 = vmatpush2.bf16.msra.mxu1 %v1842_v47  ;;  %2092 = vmatprep.subr.bf16.mxu0 %v1707_v50  ;;  %v1572_v47 = vld [vmem:[#allocation17 + $0x1f0] sm:$0xff]  ;;  %v1893_v50 = vunpack.c.h.s8.bf16 %v1637_v1 }
 0x4e7   :  { %2133 = vmatprep.subr.bf16.mxu1 %v1835_v51  ;;  %v1636_v51 = vld [vmem:[#allocation17 + $0x3f0] sm:$0xff]  ;;  %v1764_v56 = vunpack.c.h.s8.bf16 %v1572_v47 }
 0x4e8   :  { %v1892_v8 = vunpack.c.h.s8.bf16 %v1636_v51  ;;  %v1884_v52 = vunpack.c.l.s8.bf16 %v1636_v51 }
 0x4e9   :  { %2093 = vmatpush2.bf16.msra.mxu0 %v1706_v57  ;;  %v1757_v57 = vunpack.c.l.s8.bf16 %v1573_v0  ;;  %v2281_v0 = vrot.slane %v3124_v37, %v3059_v30 }
 0x4ea   :  { %2134 = vmatpush2.bf16.msra.mxu1 %v1834_v38  ;;  %2144 = vmatprep.subr.bf16.mxu0 %v1701_v9  ;;  %v1885_v38 = vunpack.c.l.s8.bf16 %v1637_v1  ;;  %v1565_v9 = vld [vmem:[#allocation17 + $0x1b8] sm:$0xff] }
 0x4eb   :  { %2185 = vmatprep.subr.bf16.mxu1 %v1829_v59  ;;  %v1756_v59 = vunpack.c.l.s8.bf16 %v1572_v47 }
 0x4ec   :  { %2095 = vmatmul.mubr.bf16.vlgmr.msra.gmra.mxu0 %v3098_v23 }
 0x4ed   :  { %2136 = vmatmul.mubr.bf16.vlgmr.msra.gmra.mxu1 %v3100_v24  ;;  %2145 = vmatpush1.bf16.msra.mxu0 %v1700_v60  ;;  %v1749_v60 = vunpack.c.h.s8.bf16 %v1565_v9 }
 0x4ee   :  { %2176 = vmatprep.mubr.bf16.mxu0 %v3094_v19  ;;  %2186 = vmatpush1.bf16.msra.mxu1 %v1828_v54  ;;  %v1589_v19 = vld [vmem:[#allocation17 + $0x278] sm:$0xff]  ;;  %v1564_v54 = vld [vmem:[#allocation17 + $0x1b0] sm:$0xff] }
 0x4ef   :  { %2217 = vmatprep.mubr.bf16.mxu1 %v3096_v20  ;;  %2146 = vmatprep.subr.bf16.mxu0 %v1693_v61  ;;  %v1669_v20 = vunpack.c.h.s8.bf16 %v1525_v55  ;;  %v1797_v49 = vunpack.c.h.s8.bf16 %v1589_v19  ;;  %v1789_v22 = vunpack.c.l.s8.bf16 %v1589_v19  ;;  %v1877_v61 = vunpack.c.h.s8.bf16 %v1629_v58 }
 0x4f0   :  { %2187 = vmatprep.subr.bf16.mxu1 %v1821_v63  ;;  %v1748_v63 = vunpack.c.h.s8.bf16 %v1564_v54 }
 0x4f1   :  { %2147 = vmatpush1.bf16.msra.mxu0 %v1692_v3  ;;  %v1741_v3 = vunpack.c.l.s8.bf16 %v1565_v9 }
 0x4f2   :  { %2188 = vmatpush1.bf16.msra.mxu1 %v1820_v4  ;;  %2148 = vmatprep.subr.bf16.mxu0 %v1685_v5  ;;  %v1869_v4 = vunpack.c.l.s8.bf16 %v1629_v58  ;;  %v1557_v5 = vld [vmem:[#allocation17 + $0x178] sm:$0xff] }
 0x4f3   :  { %2189 = vmatprep.subr.bf16.mxu1 %v1813_v7  ;;  %v1740_v7 = vunpack.c.l.s8.bf16 %v1564_v54 }
 0x4f5   :  { %2149 = vmatpush1.bf16.msra.mxu0 %v1684_v46  ;;  %v1733_v46 = vunpack.c.h.s8.bf16 %v1557_v5 }
 0x4f6   :  { %2190 = vmatpush1.bf16.msra.mxu1 %v1812_v10  ;;  %2150 = vmatprep.subr.bf16.mxu0 %v1677_v53  ;;  %v1556_v10 = vld [vmem:[#allocation17 + $0x170] sm:$0xff]  ;;  %v1861_v53 = vunpack.c.h.s8.bf16 %v1621_v6 }
 0x4f7   :  { %2191 = vmatprep.subr.bf16.mxu1 %v1805_v11  ;;  %v1620_v11 = vld [vmem:[#allocation17 + $0x370] sm:$0xff]  ;;  %v1732_v55 = vunpack.c.h.s8.bf16 %v1556_v10 }
 0x4f8   :  { %v1860_v19 = vunpack.c.h.s8.bf16 %v1620_v11  ;;  %v1852_v16 = vunpack.c.l.s8.bf16 %v1620_v11 }
 0x4f9   :  { %2151 = vmatpush1.bf16.msra.mxu0 %v1676_v12  ;;  %v1725_v12 = vunpack.c.l.s8.bf16 %v1557_v5 }
 0x4fa   :  { %2192 = vmatpush1.bf16.msra.mxu1 %v1804_v13  ;;  %2152 = vmatprep.subr.bf16.mxu0 %v1669_v20  ;;  %v1853_v13 = vunpack.c.l.s8.bf16 %v1621_v6  ;;  %v1549_v20 = vld [vmem:[#allocation17 + $0x138] sm:$0xff] }
 0x4fb   :  { %2193 = vmatprep.subr.bf16.mxu1 %v1797_v49  ;;  %v1724_v49 = vunpack.c.l.s8.bf16 %v1556_v10  ;;  %v2293_v10 = vrot.slane %v3124_v37, %v3080_v48 }
 0x4fd   :  { %2153 = vmatpush1.bf16.msra.mxu0 %v1668_v17  ;;  %v1717_v17 = vunpack.c.h.s8.bf16 %v1549_v20 }
 0x4fe   :  { %2194 = vmatpush1.bf16.msra.mxu1 %v1796_v18  ;;  %2154 = vmatprep.subr.bf16.mxu0 %v1661_v21  ;;  %v1548_v18 = vld [vmem:[#allocation17 + $0x130] sm:$0xff]  ;;  %v1845_v21 = vunpack.c.h.s8.bf16 %v1613_v14 }
 0x4ff   :  { %2195 = vmatprep.subr.bf16.mxu1 %v1789_v22  ;;  %v1612_v22 = vld [vmem:[#allocation17 + $0x330] sm:$0xff]  ;;  %v1716_v25 = vunpack.c.h.s8.bf16 %v1548_v18 }
 0x500   :  { %v1844_v27 = vunpack.c.h.s8.bf16 %v1612_v22  ;;  %v1836_v34 = vunpack.c.l.s8.bf16 %v1612_v22 }
 0x501   :  { %2155 = vmatpush1.bf16.msra.mxu0 %v1660_v28  ;;  %v1709_v28 = vunpack.c.l.s8.bf16 %v1549_v20 }
 0x502   :  { %2196 = vmatpush1.bf16.msra.mxu1 %v1788_v29  ;;  %2156 = vmatprep.subr.bf16.mxu0 %v1653_v32  ;;  %v1837_v29 = vunpack.c.l.s8.bf16 %v1613_v14  ;;  %v1708_v32 = vunpack.c.l.s8.bf16 %v1548_v18 }
 0x503   :  { %2197 = vmatprep.subr.bf16.mxu1 %v1781_v36  ;;  %v3119_v36 = vld [vmem:[%s3176_s10] sm:$0xff]  ;;  %s2888_s10 = smov [#allocation20]  }
 0x504   :  { %v2235_v1 = vrot.slane %v3119_v36, %v3064_v33  ;;  %v2243_v5 = vrot.slane %v3119_v36, %v3080_v48  ;;  %s2421_s11 = sshll.u32 %s2888_s10, 4  ;;  %s2422_s11 = int_to_ptr.vmem [resolvable:$true] %s2421_s11 }
 0x505   :  { %2157 = vmatpush1.bf16.msra.mxu0 %v1652_v39  ;;  %v2231_v39 = vrot.slane %v3119_v36, %v3059_v30  ;;  %s2812_s23 = scalar_lea.vmem %s2422_s11, 32  ;;  %p2817_p9 = scmp.lt.s32.totalorder %s2422_s11, %s2422_s11 }
 0x506   :  { %2198 = vmatpush1.bf16.msra.mxu1 %v1780_v40  ;;  %2158 = vmatprep.subr.bf16.mxu0 %v1645_v42  ;;  %p2813_p8 = scmp.ne.s32.totalorder %s2422_s11, %s2812_s23  ;;  %p2818_p10 = scmp.lt.s32.totalorder %s2812_s23, %s2812_s23 }
 0x507   :  { %2199 = vmatprep.subr.bf16.mxu1 %v1773_v43 }
 0x508   :  { %p2819_p11 = por %p2818_p10, %p2817_p9 }
 0x509   :  { %2159 = vmatpush1.bf16.msra.mxu0 %v1644_v44 }
 0x50a   :  { %2200 = vmatpush1.bf16.msra.mxu1 %v1772_v45  ;;  %2160 = vmatprep.subr.bf16.mxu0 %v1765_v31  ;;  %p2820_p12 = pnand %p2819_p11, %p2813_p8 }
 0x50b   :  { %2201 = vmatprep.subr.bf16.mxu1 %v1893_v50  ;;  %v2285_v50 = vrot.slane %v3124_v37, %v3064_v33  ;;  %v2239_v33 = vrot.slane %v3119_v36, %v3077_v15 }
 0x50d   :  { %2161 = vmatpush2.bf16.msra.mxu0 %v1764_v56 }
 0x50e   :  { %2202 = vmatpush2.bf16.msra.mxu1 %v1892_v8  ;;  %2162 = vmatprep.subr.bf16.mxu0 %v1757_v57 }
 0x50f   :  { %2203 = vmatprep.subr.bf16.mxu1 %v1885_v38 }
 0x511   :  { %2163 = vmatpush2.bf16.msra.mxu0 %v1756_v59 }
 0x512   :  { %2204 = vmatpush2.bf16.msra.mxu1 %v1884_v52  ;;  %2164 = vmatprep.subr.bf16.mxu0 %v1749_v60 }
 0x513   :  { %2205 = vmatprep.subr.bf16.mxu1 %v1877_v61 }
 0x515   :  { %2165 = vmatpush2.bf16.msra.mxu0 %v1748_v63 }
 0x516   :  { %2206 = vmatpush2.bf16.msra.mxu1 %v1876_v2  ;;  %2166 = vmatprep.subr.bf16.mxu0 %v1741_v3 }
 0x517   :  { %2207 = vmatprep.subr.bf16.mxu1 %v1869_v4  ;;  %v2289_v4 = vrot.slane %v3124_v37, %v3077_v15 }
 0x519   :  { %2167 = vmatpush2.bf16.msra.mxu0 %v1740_v7 }
 0x51a   :  { %2208 = vmatpush2.bf16.msra.mxu1 %v1868_v41  ;;  %2168 = vmatprep.subr.bf16.mxu0 %v1733_v46 }
 0x51b   :  { %2209 = vmatprep.subr.bf16.mxu1 %v1861_v53 }
 0x51d   :  { %2169 = vmatpush2.bf16.msra.mxu0 %v1732_v55 }
 0x51e   :  { %2210 = vmatpush2.bf16.msra.mxu1 %v1860_v19  ;;  %2170 = vmatprep.subr.bf16.mxu0 %v1725_v12 }
 0x51f   :  { %2211 = vmatprep.subr.bf16.mxu1 %v1853_v13 }
 0x521   :  { %2171 = vmatpush2.bf16.msra.mxu0 %v1724_v49 }
 0x522   :  { %2212 = vmatpush2.bf16.msra.mxu1 %v1852_v16  ;;  %2172 = vmatprep.subr.bf16.mxu0 %v1717_v17 }
 0x523   :  { %2213 = vmatprep.subr.bf16.mxu1 %v1845_v21 }
 0x525   :  { %2173 = vmatpush2.bf16.msra.mxu0 %v1716_v25 }
 0x526   :  { %2214 = vmatpush2.bf16.msra.mxu1 %v1844_v27  ;;  %2174 = vmatprep.subr.bf16.mxu0 %v1709_v28 }
 0x527   :  { %2215 = vmatprep.subr.bf16.mxu1 %v1837_v29 }
 0x529   :  { %2175 = vmatpush2.bf16.msra.mxu0 %v1708_v32 }
 0x52a   :  { %2216 = vmatpush2.bf16.msra.mxu1 %v1836_v34 }
 0x52c   :  { %2177 = vmatmul.mubr.bf16.vlgmr.msra.gmra.mxu0 %v3098_v23  ;;  %v1932_v40 = vpop.f32.mrf.mxu0  ;;  %v1973_v42 = vpop.f32.mrf.mxu1 }
 0x52d   :  { %2218 = vmatmul.mubr.bf16.vlgmr.msra.gmra.mxu1 %v3100_v24  ;;  %v1974_v43 = vadd.f32 %v1973_v42, %v1932_v40 }
 0x52e   :  { %v1934_v44 = vpop.f32.mrf.mxu0  ;;  %v1975_v45 = vpop.f32.mrf.mxu1 }
 0x52f   :  { %v2268_v31 = vmul.f32 %v2231_v39, %v1974_v43  ;;  %v1976_v47 = vadd.f32 %v1975_v45, %v1934_v44 }
 0x530   :  { %v1936_v51 = vpop.f32.mrf.mxu0  ;;  %v1977_v23 = vpop.f32.mrf.mxu1 }
 0x531   :  { %v2318_v56 = vadd.f32 %v2281_v0, %v2268_v31  ;;  %v2269_v8 = vmul.f32 %v2235_v1, %v1976_v47 }
 0x532   :  { %v1937_v57 = vpop.f32.mrf.mxu0  ;;  %v1978_v24 = vpop.f32.mrf.mxu1 }
 0x533   :  { %v2326_v38 = vmul.f32 0.5, %v2318_v56  ;;  %v2319_v9 = vadd.f32 %v2285_v50, %v2269_v8 }
 0x535   :  { %2596 = vtanh.f32 %v2326_v38  ;;  %v2327_v30 = vmul.f32 0.5, %v2319_v9 }
 0x537   :  { %2598 = vtanh.f32 %v2327_v30 }
 0x542   :  { %v2597_v58 = vpop.eup %2596 }
 0x543   :  { %v2342_v59 = vadd.f32 1.0, %v2597_v58 }
 0x544   :  { %v2599_v52 = vpop.eup %2598 }
 0x545   :  { %v2343_v60 = vadd.f32 1.0, %v2599_v52  ;;  %v2350_v54 = vmul.f32 0.5, %v2342_v59 }
 0x547   :  { %v2351_v61 = vmul.f32 0.5, %v2343_v60 }
 0x549   :  { %v2366_v62 = vcombine.low %v2350_v54, %v2351_v61 }
 0x54b   :  { %v2374_v48 = vrot.slane %v2366_v62, %v2996_v35 }
 0x56c   :  { %v2014_v63 = vpop.f32.mrf.mxu0  ;;  %v2055_v2 = vpop.f32.mrf.mxu1 }
 0x56d   :  { %v2056_v3 = vadd.f32 %v2055_v2, %v2014_v63 }
 0x56e   :  { %v2016_v6 = vpop.f32.mrf.mxu0  ;;  %v2057_v7 = vpop.f32.mrf.mxu1 }
 0x56f   :  { %v2270_v41 = vmul.f32 %v2239_v33, %v2056_v3  ;;  %v2058_v46 = vadd.f32 %v2057_v7, %v2016_v6 }
 0x570   :  { %v2018_v53 = vpop.f32.mrf.mxu0  ;;  %v2059_v11 = vpop.f32.mrf.mxu1 }
 0x571   :  { %v2320_v55 = vadd.f32 %v2289_v4, %v2270_v41  ;;  %v2271_v19 = vmul.f32 %v2243_v5, %v2058_v46 }
 0x572   :  { %v2019_v12 = vpop.f32.mrf.mxu0  ;;  %v2060_v13 = vpop.f32.mrf.mxu1 }
 0x573   :  { %v2328_v20 = vmul.f32 0.5, %v2320_v55  ;;  %v2321_v14 = vadd.f32 %v2293_v10, %v2271_v19 }
 0x575   :  { %2600 = vtanh.f32 %v2328_v20  ;;  %v2329_v15 = vmul.f32 0.5, %v2321_v14 }
 0x577   :  { %2602 = vtanh.f32 %v2329_v15 }
 0x582   :  { %v2601_v49 = vpop.eup %2600 }
 0x583   :  { %v2344_v16 = vadd.f32 1.0, %v2601_v49 }
 0x584   :  { %v2603_v17 = vpop.eup %2602 }
 0x585   :  { %v2345_v18 = vadd.f32 1.0, %v2603_v17  ;;  %v2352_v21 = vmul.f32 0.5, %v2344_v16 }
 0x587   :  { %v2353_v22 = vmul.f32 0.5, %v2345_v18 }
 0x589   :  { %v2367_v25 = vcombine.low %v2352_v21, %v2353_v22 }
 0x58b   :  { %v2381_v27 = vrot.slane %v2367_v25, %v2996_v35 }
 0x58d   :  { %v2382_v28 = vcombine.low %v2374_v48, %v2381_v27 }
 0x58f   :  { %2402 = vst [vmem:[#allocation19] sm:$0xff] %v2382_v28 }
 0x590   :  { %2823 = shalt.err (!%p2820_p12)
}
 0x591   :  { %2424 = dma.vmem_to_hbm [thread:$0]  %s2422_s11, 32, %s3179_s13, [#allocation21]   ;;  %v2246_v29 = vsub.s32 4, %v2993_v26  ;;  %v2250_v32 = vsub.s32 5, %v2993_v26  ;;  %v2254_v62 = vsub.s32 6, %v2993_v26  ;;  %v2258_v33 = vsub.s32 7, %v2993_v26 }
 0x592   :  { %s2889_s13 = smov [#allocation19]  }
 0x593   :  { %v2247_v39 = vrot.slane %v3119_v36, %v2246_v29  ;;  %v2297_v43 = vrot.slane %v3124_v37, %v2246_v29  ;;  %v2251_v1 = vrot.slane %v3119_v36, %v2250_v32  ;;  %v2301_v47 = vrot.slane %v3124_v37, %v2250_v32  ;;  %s2411_s25 = sshll.u32 %s2889_s13, 4  ;;  %s2412_s25 = int_to_ptr.vmem [resolvable:$true] %s2411_s25 }
 0x594   :  { %v2255_v2 = vrot.slane %v3119_v36, %v2254_v62  ;;  %v2305_v5 = vrot.slane %v3124_v37, %v2254_v62  ;;  %v2259_v7 = vrot.slane %v3119_v36, %v2258_v33  ;;  %v2309_v53 = vrot.slane %v3124_v37, %v2258_v33  ;;  %s2832_s0 = scalar_lea.vmem %s2412_s25, 256  ;;  %p2837_p0 = scmp.lt.s32.totalorder %s2412_s25, %s2412_s25 }
 0x595   :  { %p2833_p13 = scmp.ne.s32.totalorder %s2412_s25, %s2832_s0  ;;  %p2838_p1 = scmp.lt.s32.totalorder %s2832_s0, %s2832_s0 }
 0x597   :  { %p2839_p2 = por %p2838_p1, %p2837_p0 }
 0x599   :  { %p2840_p3 = pnand %p2839_p2, %p2833_p13 }
 0x5ac   :  { %v2096_v34 = vpop.f32.mrf.mxu0 }
 0x5ad   :  { %v2137_v40 = vpop.f32.mrf.mxu1 }
 0x5ae   :  { %v2138_v42 = vadd.f32 %v2137_v40, %v2096_v34  ;;  %v2098_v0 = vpop.f32.mrf.mxu0 }
 0x5af   :  { %v2139_v44 = vpop.f32.mrf.mxu1 }
 0x5b0   :  { %v2272_v45 = vmul.f32 %v2247_v39, %v2138_v42  ;;  %v2140_v31 = vadd.f32 %v2139_v44, %v2098_v0  ;;  %v2100_v50 = vpop.f32.mrf.mxu0 }
 0x5b1   :  { %v2141_v51 = vpop.f32.mrf.mxu1 }
 0x5b2   :  { %v2322_v23 = vadd.f32 %v2297_v43, %v2272_v45  ;;  %v2273_v56 = vmul.f32 %v2251_v1, %v2140_v31  ;;  %v2101_v8 = vpop.f32.mrf.mxu0 }
 0x5b3   :  { %v2142_v57 = vpop.f32.mrf.mxu1 }
 0x5b4   :  { %v2330_v24 = vmul.f32 0.5, %v2322_v23  ;;  %v2323_v38 = vadd.f32 %v2301_v47, %v2273_v56 }
 0x5b6   :  { %2604 = vtanh.f32 %v2330_v24  ;;  %v2331_v9 = vmul.f32 0.5, %v2323_v38 }
 0x5b8   :  { %2606 = vtanh.f32 %v2331_v9 }
 0x5c3   :  { %v2605_v30 = vpop.eup %2604 }
 0x5c4   :  { %v2346_v58 = vadd.f32 1.0, %v2605_v30 }
 0x5c5   :  { %v2607_v59 = vpop.eup %2606 }
 0x5c6   :  { %v2347_v52 = vadd.f32 1.0, %v2607_v59  ;;  %v2354_v60 = vmul.f32 0.5, %v2346_v58 }
 0x5c8   :  { %v2355_v54 = vmul.f32 0.5, %v2347_v52 }
 0x5ca   :  { %v2383_v61 = vcombine.low %v2354_v60, %v2355_v54 }
 0x5cc   :  { %v2391_v37 = vrot.slane %v2383_v61, %v2996_v35 }
 0x5ec   :  { %v2178_v63 = vpop.f32.mrf.mxu0 }
 0x5ed   :  { %v2219_v3 = vpop.f32.mrf.mxu1 }
 0x5ee   :  { %v2220_v4 = vadd.f32 %v2219_v3, %v2178_v63  ;;  %v2180_v6 = vpop.f32.mrf.mxu0 }
 0x5ef   :  { %v2221_v41 = vpop.f32.mrf.mxu1 }
 0x5f0   :  { %v2274_v46 = vmul.f32 %v2255_v2, %v2220_v4  ;;  %v2222_v10 = vadd.f32 %v2221_v41, %v2180_v6  ;;  %v2182_v11 = vpop.f32.mrf.mxu0 }
 0x5f1   :  { %v2223_v55 = vpop.f32.mrf.mxu1 }
 0x5f2   :  { %v2324_v19 = vadd.f32 %v2305_v5, %v2274_v46  ;;  %v2275_v12 = vmul.f32 %v2259_v7, %v2222_v10  ;;  %v2183_v26 = vpop.f32.mrf.mxu0 }
 0x5f3   :  { %v2224_v13 = vpop.f32.mrf.mxu1 }
 0x5f4   :  { %v2332_v20 = vmul.f32 0.5, %v2324_v19  ;;  %v2325_v14 = vadd.f32 %v2309_v53, %v2275_v12 }
 0x5f6   :  { %2608 = vtanh.f32 %v2332_v20  ;;  %v2333_v15 = vmul.f32 0.5, %v2325_v14 }
 0x5f8   :  { %2610 = vtanh.f32 %v2333_v15 }
 0x603   :  { %v2609_v49 = vpop.eup %2608 }
 0x604   :  { %v2348_v16 = vadd.f32 1.0, %v2609_v49 }
 0x605   :  { %v2611_v17 = vpop.eup %2610 }
 0x606   :  { %v2349_v36 = vadd.f32 1.0, %v2611_v17  ;;  %v2356_v18 = vmul.f32 0.5, %v2348_v16 }
 0x608   :  { %v2357_v21 = vmul.f32 0.5, %v2349_v36 }
 0x60a   :  { %v2384_v22 = vcombine.low %v2356_v18, %v2357_v21 }
 0x60c   :  { %v2398_v25 = vrot.slane %v2384_v22, %v2996_v35 }
 0x60e   :  { %v2399_v48 = vcombine.low %v2391_v37, %v2398_v25 }
 0x610   :  { %2403 = vst [vmem:[#allocation19 + $0x8] sm:$0xff] %v2399_v48 }
 0x611   :  { %2843 = shalt.err (!%p2840_p3)
}
 0x612   :  { %2414 = dma.vmem_to_hbm [thread:$0]  %s2412_s25, 256, %s3178_s12, [#allocation4]  }
 0x613   :  { %2864 = dma.done.wait [#allocation4], 256  }
 0x614   :  { %2865 = vsyncadd [#allocation4], 4294967040 }
 0x615   :  { %2866 = dma.done.wait [#allocation21], 32  }
 0x616   :  { %2867 = vsyncadd [#allocation21], 4294967264 }
 0x617   :  { %2431 = vsyncpa [#allocation3], 1 }
 0x618   :  { %2432 = vsyncpa [#allocation6], 1 }
 0x619   :  { %2433 = vsyncpa [#allocation9], 1 }
 0x61a   :  { %2434 = vsyncpa [#allocation12], 1 }
 0x61b   :  { %2435 = vsyncpa [#allocation15], 1 }
 0x61c   :  { %2436 = vsyncpa [#allocation18], 1 }
 0x61d   :  { %2437 = vsyncpa [#allocation4], 1 }
 0x61e   :  { %2438 = vsyncpa [#allocation21], 1 }

</bundles_post_ra>
